<compile_context>
chip_gen: v7x
topology: tpu7x:2x2x1
jax: 0.10.0
libtpu: 0.0.40
codegen_flags: <defaults>
</compile_context>

<pallas_src>
import functools

import jax
import jax.numpy as jnp
from jax.experimental import pallas as pl
from jax.experimental.pallas import tpu as pltpu


# ---------------------------------------------------------------------------
# Fused Pallas kernel
# ---------------------------------------------------------------------------

def _full_spec(shape):
    """BlockSpec covering the whole (small) array; block == full array dims."""
    nd = len(shape)
    return pl.BlockSpec(shape, lambda i, _n=nd: (0,) * _n)


def _fused_forward_kernel(adj_ref, x_ref, selg_ref, seld_ref,
                          wl1_ref, wr1_ref, b1_ref,
                          wl2_ref, wr2_ref, b2_ref,
                          w1g_ref, w1d_ref, bd1_ref, w2_ref, bd2_ref,
                          scores_ref, z_ref, *, n_dis_pad):
    """Whole ModelOne forward on VMEM-resident data.

    Node rows are stacked as [disease(0:n_dis_pad) | gene(n_dis_pad:)].
    adj is the row-normalized block adjacency so adj @ X == mean aggregation
    for BOTH edge types in one matmul.  Per-edge-type lin_l / lin_r weights are
    stacked along K (rows 0:F -> disease-dst conv, F:2F -> gene-dst conv) and
    selected via a type-mask + lane concat, so each linear is one MXU pass.
    """
    f32, bf16 = jnp.float32, jnp.bfloat16

    adj = adj_ref[...]                                    # [Ntot, Ntot] bf16
    n_tot = adj.shape[0]

    row = jax.lax.broadcasted_iota(jnp.int32, (n_tot, 1), 0)
    m_dis = (row < n_dis_pad).astype(f32)                 # 1.0 on disease rows
    m_gen = 1.0 - m_dis                                   # 1.0 on gene rows

    def hetero_sage_layer(feat_bf, wl_r, wr_r, brow_r, relu):
        # mean neighbor aggregation for both edge types at once
        agg = jnp.dot(adj, feat_bf, preferred_element_type=f32)        # [Ntot, F]
        # route each row to its edge-type weights via masked lane concat (K=2F)
        agg_w = jnp.concatenate([m_dis * agg, m_gen * agg], axis=1).astype(bf16)
        x_f = feat_bf.astype(f32)
        x_w = jnp.concatenate([m_dis * x_f, m_gen * x_f], axis=1).astype(bf16)
        h = jnp.dot(agg_w, wl_r[...], preferred_element_type=f32)      # lin_l(agg)
        h = h + jnp.dot(x_w, wr_r[...], preferred_element_type=f32)    # lin_r(x_dst)
        h = h + brow_r[...]                                            # per-type bias
        if relu:
            h = jnp.maximum(h, 0.0)
        return h

    x = x_ref[...]                                                     # bf16
    z1 = hetero_sage_layer(x, wl1_ref, wr1_ref, b1_ref, relu=True)
    z2 = hetero_sage_layer(z1.astype(bf16), wl2_ref, wr2_ref, b2_ref, relu=False)
    z_ref[...] = z2                                                    # lane-dense store

    # ---- EdgeDecoder: endpoint gathers as one-hot selection matmuls ----
    z2b = z2.astype(bf16)
    zg = jnp.dot(selg_ref[...], z2b, preferred_element_type=f32)       # z['gene'][row]
    zd = jnp.dot(seld_ref[...], z2b, preferred_element_type=f32)       # z['disease'][col]
    # lin1(cat([zg, zd], -1)) == zg @ W1g + zd @ W1d
    h = jnp.dot(zg.astype(bf16), w1g_ref[...], preferred_element_type=f32)
    h = h + jnp.dot(zd.astype(bf16), w1d_ref[...], preferred_element_type=f32)
    h = jnp.maximum(h + bd1_ref[...], 0.0)                             # .relu()
    out = jnp.dot(h.astype(bf16), w2_ref[...], preferred_element_type=f32) + bd2_ref[...]
    scores_ref[...] = out                                              # lane-dense [NE,128]


@functools.partial(jax.jit, static_argnames=("n_dis_pad",))
def fused_forward(adj, x, selg, seld, wl1, wr1, b1r, wl2, wr2, b2r,
                  w1g, w1d, bd1, w2, bd2, *, n_dis_pad):
    ne_pad = selg.shape[0]
    n_tot, f_pad = x.shape
    kernel = functools.partial(_fused_forward_kernel, n_dis_pad=n_dis_pad)
    ins = (adj, x, selg, seld, wl1, wr1, b1r, wl2, wr2, b2r, w1g, w1d, bd1, w2, bd2)
    scores_pad, z_pad = pl.pallas_call(
        kernel,
        out_shape=(jax.ShapeDtypeStruct((ne_pad, f_pad), jnp.float32),
                   jax.ShapeDtypeStruct((n_tot, f_pad), jnp.float32)),
        grid=(1,),
        in_specs=[_full_spec(a.shape) for a in ins],
        out_specs=(_full_spec((ne_pad, f_pad)), _full_spec((n_tot, f_pad))),
        compiler_params=pltpu.CompilerParams(dimension_semantics=("arbitrary",)),
    )(*ins)
    return scores_pad, z_pad


# ---------------------------------------------------------------------------
# One-time preparation (hoisted out of the hot path)
# ---------------------------------------------------------------------------

def _round_up(x, m):
    return (x + m - 1) // m * m


def _pad2(a, rows, cols):
    out = jnp.zeros((rows, cols), a.dtype)
    return out.at[: a.shape[0], : a.shape[1]].set(a)


def init_sage_params(key, f_in, f_out):
    k1, k2, k3 = jax.random.split(key, 3)
    return {
        "wl_t": jax.random.normal(k1, (f_in, f_out), jnp.float32) * 0.1,  # lin_l W^T
        "bl":   jax.random.normal(k2, (1, f_out), jnp.float32) * 0.01,    # lin_l bias
        "wr_t": jax.random.normal(k3, (f_in, f_out), jnp.float32) * 0.1,  # lin_r W^T
    }


def init_model_params(key, hidden):
    assert hidden == 20, "module declares SAGEConv(20, hidden) for both layers"
    ks = jax.random.split(key, 8)
    g2d = ("gene", "to", "disease")
    d2g = ("disease", "rev_to", "gene")
    return {
        "conv1": {g2d: init_sage_params(ks[0], 20, hidden),
                  d2g: init_sage_params(ks[1], 20, hidden)},
        "conv2": {g2d: init_sage_params(ks[2], 20, hidden),
                  d2g: init_sage_params(ks[3], 20, hidden)},
        "lin1_w": jax.random.normal(ks[4], (hidden, 2 * hidden), jnp.float32) * 0.1,
        "lin1_b": jax.random.normal(ks[5], (1, hidden), jnp.float32) * 0.01,
        "lin2_w": jax.random.normal(ks[6], (1, hidden), jnp.float32) * 0.1,
        "lin2_b": jax.random.normal(ks[7], (1, 1), jnp.float32) * 0.01,
    }


def prepare_params(params, hidden, f_pad, n_dis_pad, n_gene_pad):
    """Pad to lane-dense 128 features, stack per-edge-type weights, cast bf16."""
    g2d = ("gene", "to", "disease")
    d2g = ("disease", "rev_to", "gene")

    def stack_layer(layer):
        wl = jnp.concatenate([_pad2(layer[g2d]["wl_t"], f_pad, f_pad),
                              _pad2(layer[d2g]["wl_t"], f_pad, f_pad)], axis=0)
        wr = jnp.concatenate([_pad2(layer[g2d]["wr_t"], f_pad, f_pad),
                              _pad2(layer[d2g]["wr_t"], f_pad, f_pad)], axis=0)
        b_rows = jnp.concatenate(
            [jnp.tile(_pad2(layer[g2d]["bl"], 1, f_pad), (n_dis_pad, 1)),
             jnp.tile(_pad2(layer[d2g]["bl"], 1, f_pad), (n_gene_pad, 1))], axis=0)
        return wl.astype(jnp.bfloat16), wr.astype(jnp.bfloat16), b_rows

    wl1, wr1, b1r = stack_layer(params["conv1"])
    wl2, wr2, b2r = stack_layer(params["conv2"])

    return {
        "wl1": wl1, "wr1": wr1, "b1r": b1r,
        "wl2": wl2, "wr2": wr2, "b2r": b2r,
        "w1g": _pad2(params["lin1_w"][:, :hidden].T, f_pad, f_pad).astype(jnp.bfloat16),
        "w1d": _pad2(params["lin1_w"][:, hidden:].T, f_pad, f_pad).astype(jnp.bfloat16),
        "bd1": _pad2(params["lin1_b"], 1, f_pad),
        "w2":  _pad2(params["lin2_w"].T, f_pad, f_pad).astype(jnp.bfloat16),
        "bd2": _pad2(params["lin2_b"], 1, f_pad),
    }


def prepare_graph(edge_index_dict, edge_label_index, n_dis_pad, n_gene_pad, ne_pad):
    """Block adjacency (mean agg for both edge types) + endpoint one-hot selectors."""
    n_tot = n_dis_pad + n_gene_pad
    g2d = ("gene", "to", "disease")
    d2g = ("disease", "rev_to", "gene")
    src_g, dst_d = edge_index_dict[g2d][0], edge_index_dict[g2d][1]
    src_d, dst_g = edge_index_dict[d2g][0], edge_index_dict[d2g][1]
    # stacked node ids: disease -> [0, n_dis), gene -> [n_dis_pad, n_dis_pad + n_gene)
    dst_all = jnp.concatenate([dst_d, n_dis_pad + dst_g])
    src_all = jnp.concatenate([n_dis_pad + src_g, src_d])
    a = jnp.zeros((n_tot, n_tot), jnp.float32).at[dst_all, src_all].add(1.0)
    deg = a.sum(axis=-1, keepdims=True)
    adj = (a / jnp.maximum(deg, 1.0)).astype(jnp.bfloat16)

    row, col = edge_label_index[0], edge_label_index[1]
    selg = _pad2(jax.nn.one_hot(n_dis_pad + row, n_tot, dtype=jnp.float32),
                 ne_pad, n_tot).astype(jnp.bfloat16)
    seld = _pad2(jax.nn.one_hot(col, n_tot, dtype=jnp.float32),
                 ne_pad, n_tot).astype(jnp.bfloat16)
    return adj, selg, seld


def prepare_features(x_dict, f_pad, n_dis_pad, n_gene_pad):
    n_tot = n_dis_pad + n_gene_pad
    x = jnp.zeros((n_tot, f_pad), jnp.float32)
    xd, xg = x_dict["disease"], x_dict["gene"]
    x = x.at[: xd.shape[0], : xd.shape[1]].set(xd)
    x = x.at[n_dis_pad: n_dis_pad + xg.shape[0], : xg.shape[1]].set(xg)
    return x.astype(jnp.bfloat16)


def model_one_forward(pp, adj, selg, seld, x_stacked,
                      n_gene, n_dis, n_dis_pad, hidden, n_label_edges):
    scores_pad, z_pad = fused_forward(
        adj, x_stacked, selg, seld,
        pp["wl1"], pp["wr1"], pp["b1r"], pp["wl2"], pp["wr2"], pp["b2r"],
        pp["w1g"], pp["w1d"], pp["bd1"], pp["w2"], pp["bd2"],
        n_dis_pad=n_dis_pad)
    scores = scores_pad[:n_label_edges, 0]                 # z.view(-1)
    z_dict = {"gene": z_pad[n_dis_pad: n_dis_pad + n_gene, :hidden],
              "disease": z_pad[:n_dis, :hidden]}
    return scores, z_dict


# ---------------------------------------------------------------------------
# main
# ---------------------------------------------------------------------------

if __name__ == "__main__":
    hidden = 20          # must equal 20 (see module spec)
    f_in = 20
    n_gene, n_disease = 12, 10
    n_edges, n_label_edges = 24, 16

    F_PAD = 128                              # lane-dense feature width
    N_DIS_PAD = _round_up(n_disease, 16)     # bf16 sublane packing
    N_GENE_PAD = _round_up(n_gene, 16)
    NE_PAD = _round_up(n_label_edges, 16)

    key = jax.random.PRNGKey(0)
    k_x1, k_x2, k_e1, k_e2, k_l1, k_l2, k_p = jax.random.split(key, 7)

    x_dict = {
        "gene":    jax.random.normal(k_x1, (n_gene, f_in), jnp.float32),
        "disease": jax.random.normal(k_x2, (n_disease, f_in), jnp.float32),
    }
    e_src = jax.random.randint(k_e1, (n_edges,), 0, n_gene)
    e_dst = jax.random.randint(k_e2, (n_edges,), 0, n_disease)
    edge_index_dict = {
        ("gene", "to", "disease"):     jnp.stack([e_src, e_dst]).astype(jnp.int32),
        ("disease", "rev_to", "gene"): jnp.stack([e_dst, e_src]).astype(jnp.int32),
    }
    edge_label_index = jnp.stack([
        jax.random.randint(k_l1, (n_label_edges,), 0, n_gene),
        jax.random.randint(k_l2, (n_label_edges,), 0, n_disease),
    ]).astype(jnp.int32)

    # --- one-time prep (NOT on the per-forward hot path) ---
    raw_params = init_model_params(k_p, hidden)
    pp = prepare_params(raw_params, hidden, F_PAD, N_DIS_PAD, N_GENE_PAD)
    adj, selg, seld = prepare_graph(edge_index_dict, edge_label_index,
                                    N_DIS_PAD, N_GENE_PAD, NE_PAD)
    x_stacked = prepare_features(x_dict, F_PAD, N_DIS_PAD, N_GENE_PAD)

    # --- forward: one fused Pallas kernel ---
    scores, z_dict = model_one_forward(pp, adj, selg, seld, x_stacked,
                                       n_gene, n_disease, N_DIS_PAD,
                                       hidden, n_label_edges)
    jax.block_until_ready((scores, z_dict))

    assert scores.shape == (n_label_edges,)
    assert z_dict["gene"].shape == (n_gene, hidden)
    assert z_dict["disease"].shape == (n_disease, hidden)
    print("KERNEL_OK")
</pallas_src>

<mosaic_0001>
module attributes {stable_mosaic.version = 11 : i64} {
  func.func @_fused_forward_kernel(%arg0: i32, %arg1: memref<32x32xbf16, #tpu.memory_space<vmem>>, %arg2: memref<32x128xbf16, #tpu.memory_space<vmem>>, %arg3: memref<16x32xbf16, #tpu.memory_space<vmem>>, %arg4: memref<16x32xbf16, #tpu.memory_space<vmem>>, %arg5: memref<256x128xbf16, #tpu.memory_space<vmem>>, %arg6: memref<256x128xbf16, #tpu.memory_space<vmem>>, %arg7: memref<32x128xf32, #tpu.memory_space<vmem>>, %arg8: memref<256x128xbf16, #tpu.memory_space<vmem>>, %arg9: memref<256x128xbf16, #tpu.memory_space<vmem>>, %arg10: memref<32x128xf32, #tpu.memory_space<vmem>>, %arg11: memref<128x128xbf16, #tpu.memory_space<vmem>>, %arg12: memref<128x128xbf16, #tpu.memory_space<vmem>>, %arg13: memref<1x128xf32, #tpu.memory_space<vmem>>, %arg14: memref<128x128xbf16, #tpu.memory_space<vmem>>, %arg15: memref<1x128xf32, #tpu.memory_space<vmem>>, %arg16: memref<16x128xf32, #tpu.memory_space<vmem>>, %arg17: memref<32x128xf32, #tpu.memory_space<vmem>>) attributes {dimension_semantics = [#tpu.dimension_semantics<arbitrary>], iteration_bounds = array<i64: 1>, scalar_prefetch = 0 : i64, scratch_operands = 0 : i64, tpu.core_type = #tpu.core_type<tc>, window_params = [{pipeline_mode = #tpu.pipeline_mode<synchronous>, transform_indices = @transform_0, window_bounds = array<i64: 32, 32>}, {pipeline_mode = #tpu.pipeline_mode<synchronous>, transform_indices = @transform_1, window_bounds = array<i64: 32, 128>}, {pipeline_mode = #tpu.pipeline_mode<synchronous>, transform_indices = @transform_2, window_bounds = array<i64: 16, 32>}, {pipeline_mode = #tpu.pipeline_mode<synchronous>, transform_indices = @transform_3, window_bounds = array<i64: 16, 32>}, {pipeline_mode = #tpu.pipeline_mode<synchronous>, transform_indices = @transform_4, window_bounds = array<i64: 256, 128>}, {pipeline_mode = #tpu.pipeline_mode<synchronous>, transform_indices = @transform_5, window_bounds = array<i64: 256, 128>}, {pipeline_mode = #tpu.pipeline_mode<synchronous>, transform_indices = @transform_6, window_bounds = array<i64: 32, 128>}, {pipeline_mode = #tpu.pipeline_mode<synchronous>, transform_indices = @transform_7, window_bounds = array<i64: 256, 128>}, {pipeline_mode = #tpu.pipeline_mode<synchronous>, transform_indices = @transform_8, window_bounds = array<i64: 256, 128>}, {pipeline_mode = #tpu.pipeline_mode<synchronous>, transform_indices = @transform_9, window_bounds = array<i64: 32, 128>}, {pipeline_mode = #tpu.pipeline_mode<synchronous>, transform_indices = @transform_10, window_bounds = array<i64: 128, 128>}, {pipeline_mode = #tpu.pipeline_mode<synchronous>, transform_indices = @transform_11, window_bounds = array<i64: 128, 128>}, {pipeline_mode = #tpu.pipeline_mode<synchronous>, transform_indices = @transform_12, window_bounds = array<i64: 1, 128>}, {pipeline_mode = #tpu.pipeline_mode<synchronous>, transform_indices = @transform_13, window_bounds = array<i64: 128, 128>}, {pipeline_mode = #tpu.pipeline_mode<synchronous>, transform_indices = @transform_14, window_bounds = array<i64: 1, 128>}, {pipeline_mode = #tpu.pipeline_mode<synchronous>, transform_indices = @transform_15, window_bounds = array<i64: 16, 128>}, {pipeline_mode = #tpu.pipeline_mode<synchronous>, transform_indices = @transform_16, window_bounds = array<i64: 32, 128>}]} {
    %c0 = arith.constant 0 : index
    %c0_0 = arith.constant 0 : index
    %0 = vector.load %arg1[%c0, %c0_0] : memref<32x32xbf16, #tpu.memory_space<vmem>>, vector<32x32xbf16>
    %1 = tpu.iota {dimensions = array<i32: 0>} : vector<32x1xi32>
    %c16_i32 = arith.constant 16 : i32
    %2 = vector.broadcast %c16_i32 : i32 to vector<32x1xi32>
    %3 = arith.cmpi slt, %1, %2 : vector<32x1xi32>
    %4 = arith.extui %3 : vector<32x1xi1> to vector<32x1xi32>
    %5 = arith.sitofp %4 : vector<32x1xi32> to vector<32x1xf32>
    %cst = arith.constant 1.000000e+00 : f32
    %6 = vector.broadcast %cst : f32 to vector<32x1xf32>
    %7 = arith.subf %6, %5 : vector<32x1xf32>
    %c0_1 = arith.constant 0 : index
    %c0_2 = arith.constant 0 : index
    %8 = vector.load %arg2[%c0_1, %c0_2] : memref<32x128xbf16, #tpu.memory_space<vmem>>, vector<32x128xbf16>
    %cst_3 = arith.constant dense<0.000000e+00> : vector<32x128xf32>
    %9 = tpu.matmul %0, %8, %cst_3 {dimension_numbers = #tpu.dot_dimension_numbers<[1], [0], [0], [1], [0, 0, 1, 1], [], []>} : vector<32x32xbf16>, vector<32x128xbf16>, vector<32x128xf32> -> vector<32x128xf32>
    %10 = vector.broadcast %5 : vector<32x1xf32> to vector<32x128xf32>
    %11 = arith.mulf %10, %9 : vector<32x128xf32>
    %12 = vector.broadcast %7 : vector<32x1xf32> to vector<32x128xf32>
    %13 = arith.mulf %12, %9 : vector<32x128xf32>
    %14 = tpu.concatenate %11, %13 in 1 : vector<32x128xf32>, vector<32x128xf32> -> vector<32x256xf32>
    %15 = arith.truncf %14 : vector<32x256xf32> to vector<32x256xbf16>
    %16 = arith.extf %8 : vector<32x128xbf16> to vector<32x128xf32>
    %17 = vector.broadcast %5 : vector<32x1xf32> to vector<32x128xf32>
    %18 = arith.mulf %17, %16 : vector<32x128xf32>
    %19 = vector.broadcast %7 : vector<32x1xf32> to vector<32x128xf32>
    %20 = arith.mulf %19, %16 : vector<32x128xf32>
    %21 = tpu.concatenate %18, %20 in 1 : vector<32x128xf32>, vector<32x128xf32> -> vector<32x256xf32>
    %22 = arith.truncf %21 : vector<32x256xf32> to vector<32x256xbf16>
    %c0_4 = arith.constant 0 : index
    %c0_5 = arith.constant 0 : index
    %23 = vector.load %arg5[%c0_4, %c0_5] : memref<256x128xbf16, #tpu.memory_space<vmem>>, vector<256x128xbf16>
    %cst_6 = arith.constant dense<0.000000e+00> : vector<32x128xf32>
    %24 = tpu.matmul %15, %23, %cst_6 {dimension_numbers = #tpu.dot_dimension_numbers<[1], [0], [0], [1], [0, 0, 1, 1], [], []>} : vector<32x256xbf16>, vector<256x128xbf16>, vector<32x128xf32> -> vector<32x128xf32>
    %c0_7 = arith.constant 0 : index
    %c0_8 = arith.constant 0 : index
    %25 = vector.load %arg6[%c0_7, %c0_8] : memref<256x128xbf16, #tpu.memory_space<vmem>>, vector<256x128xbf16>
    %cst_9 = arith.constant dense<0.000000e+00> : vector<32x128xf32>
    %26 = tpu.matmul %22, %25, %cst_9 {dimension_numbers = #tpu.dot_dimension_numbers<[1], [0], [0], [1], [0, 0, 1, 1], [], []>} : vector<32x256xbf16>, vector<256x128xbf16>, vector<32x128xf32> -> vector<32x128xf32>
    %27 = arith.addf %24, %26 : vector<32x128xf32>
    %c0_10 = arith.constant 0 : index
    %c0_11 = arith.constant 0 : index
    %28 = vector.load %arg7[%c0_10, %c0_11] : memref<32x128xf32, #tpu.memory_space<vmem>>, vector<32x128xf32>
    %29 = arith.addf %27, %28 : vector<32x128xf32>
    %cst_12 = arith.constant 0.000000e+00 : f32
    %30 = vector.broadcast %cst_12 : f32 to vector<32x128xf32>
    %31 = arith.maximumf %29, %30 : vector<32x128xf32>
    %32 = arith.truncf %31 : vector<32x128xf32> to vector<32x128xbf16>
    %cst_13 = arith.constant dense<0.000000e+00> : vector<32x128xf32>
    %33 = tpu.matmul %0, %32, %cst_13 {dimension_numbers = #tpu.dot_dimension_numbers<[1], [0], [0], [1], [0, 0, 1, 1], [], []>} : vector<32x32xbf16>, vector<32x128xbf16>, vector<32x128xf32> -> vector<32x128xf32>
    %34 = vector.broadcast %5 : vector<32x1xf32> to vector<32x128xf32>
    %35 = arith.mulf %34, %33 : vector<32x128xf32>
    %36 = vector.broadcast %7 : vector<32x1xf32> to vector<32x128xf32>
    %37 = arith.mulf %36, %33 : vector<32x128xf32>
    %38 = tpu.concatenate %35, %37 in 1 : vector<32x128xf32>, vector<32x128xf32> -> vector<32x256xf32>
    %39 = arith.truncf %38 : vector<32x256xf32> to vector<32x256xbf16>
    %40 = arith.extf %32 : vector<32x128xbf16> to vector<32x128xf32>
    %41 = vector.broadcast %5 : vector<32x1xf32> to vector<32x128xf32>
    %42 = arith.mulf %41, %40 : vector<32x128xf32>
    %43 = vector.broadcast %7 : vector<32x1xf32> to vector<32x128xf32>
    %44 = arith.mulf %43, %40 : vector<32x128xf32>
    %45 = tpu.concatenate %42, %44 in 1 : vector<32x128xf32>, vector<32x128xf32> -> vector<32x256xf32>
    %46 = arith.truncf %45 : vector<32x256xf32> to vector<32x256xbf16>
    %c0_14 = arith.constant 0 : index
    %c0_15 = arith.constant 0 : index
    %47 = vector.load %arg8[%c0_14, %c0_15] : memref<256x128xbf16, #tpu.memory_space<vmem>>, vector<256x128xbf16>
    %cst_16 = arith.constant dense<0.000000e+00> : vector<32x128xf32>
    %48 = tpu.matmul %39, %47, %cst_16 {dimension_numbers = #tpu.dot_dimension_numbers<[1], [0], [0], [1], [0, 0, 1, 1], [], []>} : vector<32x256xbf16>, vector<256x128xbf16>, vector<32x128xf32> -> vector<32x128xf32>
    %c0_17 = arith.constant 0 : index
    %c0_18 = arith.constant 0 : index
    %49 = vector.load %arg9[%c0_17, %c0_18] : memref<256x128xbf16, #tpu.memory_space<vmem>>, vector<256x128xbf16>
    %cst_19 = arith.constant dense<0.000000e+00> : vector<32x128xf32>
    %50 = tpu.matmul %46, %49, %cst_19 {dimension_numbers = #tpu.dot_dimension_numbers<[1], [0], [0], [1], [0, 0, 1, 1], [], []>} : vector<32x256xbf16>, vector<256x128xbf16>, vector<32x128xf32> -> vector<32x128xf32>
    %51 = arith.addf %48, %50 : vector<32x128xf32>
    %c0_20 = arith.constant 0 : index
    %c0_21 = arith.constant 0 : index
    %52 = vector.load %arg10[%c0_20, %c0_21] : memref<32x128xf32, #tpu.memory_space<vmem>>, vector<32x128xf32>
    %53 = arith.addf %51, %52 : vector<32x128xf32>
    %c0_22 = arith.constant 0 : index
    %c0_23 = arith.constant 0 : index
    %54 = vector.load %arg17[%c0_22, %c0_23] : memref<32x128xf32, #tpu.memory_space<vmem>>, vector<32x128xf32>
    tpu.vector_store %arg17[%c0_22, %c0_23], %53 {strides = array<i32>} : memref<32x128xf32, #tpu.memory_space<vmem>>, vector<32x128xf32>,
    %55 = arith.truncf %53 : vector<32x128xf32> to vector<32x128xbf16>
    %c0_24 = arith.constant 0 : index
    %c0_25 = arith.constant 0 : index
    %56 = vector.load %arg3[%c0_24, %c0_25] : memref<16x32xbf16, #tpu.memory_space<vmem>>, vector<16x32xbf16>
    %cst_26 = arith.constant dense<0.000000e+00> : vector<16x128xf32>
    %57 = tpu.matmul %56, %55, %cst_26 {dimension_numbers = #tpu.dot_dimension_numbers<[1], [0], [0], [1], [0, 0, 1, 1], [], []>} : vector<16x32xbf16>, vector<32x128xbf16>, vector<16x128xf32> -> vector<16x128xf32>
    %c0_27 = arith.constant 0 : index
    %c0_28 = arith.constant 0 : index
    %58 = vector.load %arg4[%c0_27, %c0_28] : memref<16x32xbf16, #tpu.memory_space<vmem>>, vector<16x32xbf16>
    %cst_29 = arith.constant dense<0.000000e+00> : vector<16x128xf32>
    %59 = tpu.matmul %58, %55, %cst_29 {dimension_numbers = #tpu.dot_dimension_numbers<[1], [0], [0], [1], [0, 0, 1, 1], [], []>} : vector<16x32xbf16>, vector<32x128xbf16>, vector<16x128xf32> -> vector<16x128xf32>
    %60 = arith.truncf %57 : vector<16x128xf32> to vector<16x128xbf16>
    %c0_30 = arith.constant 0 : index
    %c0_31 = arith.constant 0 : index
    %61 = vector.load %arg11[%c0_30, %c0_31] : memref<128x128xbf16, #tpu.memory_space<vmem>>, vector<128x128xbf16>
    %cst_32 = arith.constant dense<0.000000e+00> : vector<16x128xf32>
    %62 = tpu.matmul %60, %61, %cst_32 {dimension_numbers = #tpu.dot_dimension_numbers<[1], [0], [0], [1], [0, 0, 1, 1], [], []>} : vector<16x128xbf16>, vector<128x128xbf16>, vector<16x128xf32> -> vector<16x128xf32>
    %63 = arith.truncf %59 : vector<16x128xf32> to vector<16x128xbf16>
    %c0_33 = arith.constant 0 : index
    %c0_34 = arith.constant 0 : index
    %64 = vector.load %arg12[%c0_33, %c0_34] : memref<128x128xbf16, #tpu.memory_space<vmem>>, vector<128x128xbf16>
    %cst_35 = arith.constant dense<0.000000e+00> : vector<16x128xf32>
    %65 = tpu.matmul %63, %64, %cst_35 {dimension_numbers = #tpu.dot_dimension_numbers<[1], [0], [0], [1], [0, 0, 1, 1], [], []>} : vector<16x128xbf16>, vector<128x128xbf16>, vector<16x128xf32> -> vector<16x128xf32>
    %66 = arith.addf %62, %65 : vector<16x128xf32>
    %c0_36 = arith.constant 0 : index
    %c0_37 = arith.constant 0 : index
    %67 = vector.load %arg13[%c0_36, %c0_37] : memref<1x128xf32, #tpu.memory_space<vmem>>, vector<1x128xf32>
    %68 = vector.broadcast %67 : vector<1x128xf32> to vector<16x128xf32>
    %69 = arith.addf %66, %68 : vector<16x128xf32>
    %cst_38 = arith.constant 0.000000e+00 : f32
    %70 = vector.broadcast %cst_38 : f32 to vector<16x128xf32>
    %71 = arith.maximumf %69, %70 : vector<16x128xf32>
    %72 = arith.truncf %71 : vector<16x128xf32> to vector<16x128xbf16>
    %c0_39 = arith.constant 0 : index
    %c0_40 = arith.constant 0 : index
    %73 = vector.load %arg14[%c0_39, %c0_40] : memref<128x128xbf16, #tpu.memory_space<vmem>>, vector<128x128xbf16>
    %cst_41 = arith.constant dense<0.000000e+00> : vector<16x128xf32>
    %74 = tpu.matmul %72, %73, %cst_41 {dimension_numbers = #tpu.dot_dimension_numbers<[1], [0], [0], [1], [0, 0, 1, 1], [], []>} : vector<16x128xbf16>, vector<128x128xbf16>, vector<16x128xf32> -> vector<16x128xf32>
    %c0_42 = arith.constant 0 : index
    %c0_43 = arith.constant 0 : index
    %75 = vector.load %arg15[%c0_42, %c0_43] : memref<1x128xf32, #tpu.memory_space<vmem>>, vector<1x128xf32>
    %76 = vector.broadcast %75 : vector<1x128xf32> to vector<16x128xf32>
    %77 = arith.addf %74, %76 : vector<16x128xf32>
    %c0_44 = arith.constant 0 : index
    %c0_45 = arith.constant 0 : index
    %78 = vector.load %arg16[%c0_44, %c0_45] : memref<16x128xf32, #tpu.memory_space<vmem>>, vector<16x128xf32>
    tpu.vector_store %arg16[%c0_44, %c0_45], %77 {strides = array<i32>} : memref<16x128xf32, #tpu.memory_space<vmem>>, vector<16x128xf32>,
    return
  }
  func.func @transform_0(%arg0: i32) -> (i32, i32) {
    %c0_i32 = arith.constant 0 : i32
    %c0_i32_0 = arith.constant 0 : i32
    %c0_i32_1 = arith.constant 0 : i32
    return %c0_i32, %c0_i32_0 : i32, i32
  }
  func.func @transform_1(%arg0: i32) -> (i32, i32) {
    %c0_i32 = arith.constant 0 : i32
    %c0_i32_0 = arith.constant 0 : i32
    %c0_i32_1 = arith.constant 0 : i32
    return %c0_i32, %c0_i32_0 : i32, i32
  }
  func.func @transform_2(%arg0: i32) -> (i32, i32) {
    %c0_i32 = arith.constant 0 : i32
    %c0_i32_0 = arith.constant 0 : i32
    %c0_i32_1 = arith.constant 0 : i32
    return %c0_i32, %c0_i32_0 : i32, i32
  }
  func.func @transform_3(%arg0: i32) -> (i32, i32) {
    %c0_i32 = arith.constant 0 : i32
    %c0_i32_0 = arith.constant 0 : i32
    %c0_i32_1 = arith.constant 0 : i32
    return %c0_i32, %c0_i32_0 : i32, i32
  }
  func.func @transform_4(%arg0: i32) -> (i32, i32) {
    %c0_i32 = arith.constant 0 : i32
    %c0_i32_0 = arith.constant 0 : i32
    %c0_i32_1 = arith.constant 0 : i32
    return %c0_i32, %c0_i32_0 : i32, i32
  }
  func.func @transform_5(%arg0: i32) -> (i32, i32) {
    %c0_i32 = arith.constant 0 : i32
    %c0_i32_0 = arith.constant 0 : i32
    %c0_i32_1 = arith.constant 0 : i32
    return %c0_i32, %c0_i32_0 : i32, i32
  }
  func.func @transform_6(%arg0: i32) -> (i32, i32) {
    %c0_i32 = arith.constant 0 : i32
    %c0_i32_0 = arith.constant 0 : i32
    %c0_i32_1 = arith.constant 0 : i32
    return %c0_i32, %c0_i32_0 : i32, i32
  }
  func.func @transform_7(%arg0: i32) -> (i32, i32) {
    %c0_i32 = arith.constant 0 : i32
    %c0_i32_0 = arith.constant 0 : i32
    %c0_i32_1 = arith.constant 0 : i32
    return %c0_i32, %c0_i32_0 : i32, i32
  }
  func.func @transform_8(%arg0: i32) -> (i32, i32) {
    %c0_i32 = arith.constant 0 : i32
    %c0_i32_0 = arith.constant 0 : i32
    %c0_i32_1 = arith.constant 0 : i32
    return %c0_i32, %c0_i32_0 : i32, i32
  }
  func.func @transform_9(%arg0: i32) -> (i32, i32) {
    %c0_i32 = arith.constant 0 : i32
    %c0_i32_0 = arith.constant 0 : i32
    %c0_i32_1 = arith.constant 0 : i32
    return %c0_i32, %c0_i32_0 : i32, i32
  }
  func.func @transform_10(%arg0: i32) -> (i32, i32) {
    %c0_i32 = arith.constant 0 : i32
    %c0_i32_0 = arith.constant 0 : i32
    %c0_i32_1 = arith.constant 0 : i32
    return %c0_i32, %c0_i32_0 : i32, i32
  }
  func.func @transform_11(%arg0: i32) -> (i32, i32) {
    %c0_i32 = arith.constant 0 : i32
    %c0_i32_0 = arith.constant 0 : i32
    %c0_i32_1 = arith.constant 0 : i32
    return %c0_i32, %c0_i32_0 : i32, i32
  }
  func.func @transform_12(%arg0: i32) -> (i32, i32) {
    %c0_i32 = arith.constant 0 : i32
    %c0_i32_0 = arith.constant 0 : i32
    %c0_i32_1 = arith.constant 0 : i32
    return %c0_i32, %c0_i32_0 : i32, i32
  }
  func.func @transform_13(%arg0: i32) -> (i32, i32) {
    %c0_i32 = arith.constant 0 : i32
    %c0_i32_0 = arith.constant 0 : i32
    %c0_i32_1 = arith.constant 0 : i32
    return %c0_i32, %c0_i32_0 : i32, i32
  }
  func.func @transform_14(%arg0: i32) -> (i32, i32) {
    %c0_i32 = arith.constant 0 : i32
    %c0_i32_0 = arith.constant 0 : i32
    %c0_i32_1 = arith.constant 0 : i32
    return %c0_i32, %c0_i32_0 : i32, i32
  }
  func.func @transform_15(%arg0: i32) -> (i32, i32) {
    %c0_i32 = arith.constant 0 : i32
    %c0_i32_0 = arith.constant 0 : i32
    %c0_i32_1 = arith.constant 0 : i32
    return %c0_i32, %c0_i32_0 : i32, i32
  }
  func.func @transform_16(%arg0: i32) -> (i32, i32) {
    %c0_i32 = arith.constant 0 : i32
    %c0_i32_0 = arith.constant 0 : i32
    %c0_i32_1 = arith.constant 0 : i32
    return %c0_i32, %c0_i32_0 : i32, i32
  }
}

</mosaic_0001>

<bundles_post_ra>
// kernel: fused_forward.1
= control target key start
LH: loop header
LB: loop body
LE: loop exit
PB: predicated region body
PF: predicated region fallthrough
CT: control target
= control target key end

     0   :  { %s2863_s0 = inlined_call_operand.hbm [shape: bf16[32,32], index: 0, kind: input, shape index: {}]   ;;  %s2864_s1 = inlined_call_operand.hbm [shape: bf16[32,128], index: 1, kind: input, shape index: {}]   ;;  %s2865_s2 = inlined_call_operand.hbm [shape: bf16[16,32], index: 2, kind: input, shape index: {}]   ;;  %s2866_s3 = inlined_call_operand.hbm [shape: bf16[16,32], index: 3, kind: input, shape index: {}]   ;;  %s2867_s4 = inlined_call_operand.hbm [shape: bf16[256,128], index: 4, kind: input, shape index: {}]   ;;  %s2868_s5 = inlined_call_operand.hbm [shape: bf16[256,128], index: 5, kind: input, shape index: {}]   ;;  %s2869_s6 = inlined_call_operand.hbm [shape: f32[32,128], index: 6, kind: input, shape index: {}]   ;;  %s2870_s7 = inlined_call_operand.hbm [shape: bf16[256,128], index: 7, kind: input, shape index: {}]   ;;  %s2871_s8 = inlined_call_operand.hbm [shape: bf16[256,128], index: 8, kind: input, shape index: {}]   ;;  %s2872_s9 = inlined_call_operand.vmem [shape: f32[32,128], index: 9, kind: input, shape index: {}]   ;;  %s2873_s10 = inlined_call_operand.hbm [shape: bf16[128,128], index: 10, kind: input, shape index: {}]   ;;  %s2874_s11 = inlined_call_operand.hbm [shape: bf16[128,128], index: 11, kind: input, shape index: {}]   ;;  %s2875_s12 = inlined_call_operand.vmem [shape: f32[1,128], index: 12, kind: input, shape index: {}]   ;;  %s2876_s13 = inlined_call_operand.hbm [shape: bf16[128,128], index: 13, kind: input, shape index: {}]   ;;  %s2877_s14 = inlined_call_operand.vmem [shape: f32[1,128], index: 14, kind: input, shape index: {}]   ;;  %s2878_s15 = inlined_call_operand.hbm [shape: f32[16,128], index: 15, kind: output, shape index: {0}]   ;;  %s2879_s16 = inlined_call_operand.hbm [shape: f32[32,128], index: 16, kind: output, shape index: {1}]  }
   0x1   :  { %2881 = sst [smem:[#allocation34_spill]] %s2863_s0 }
   0x2   :  { %22 = vsyncpa [#allocation3], 0 }
   0x3   :  { %23 = vsyncpa [#allocation6], 0 }
   0x4   :  { %24 = vsyncpa [#allocation9], 0 }
   0x5   :  { %25 = vsyncpa [#allocation12], 0 }
   0x6   :  { %26 = vsyncpa [#allocation15], 0 }
   0x7   :  { %27 = vsyncpa [#allocation18], 0 }
   0x8   :  { %28 = vsyncpa [#allocation21], 0 }
   0x9   :  { %29 = vsyncpa [#allocation4], 0 }
   0xa   :  { %30 = vsyncpa [#allocation24], 0  ;;  %s2436_s21 = smov [#allocation5]   ;;  %s2437_s23 = smov [#allocation8]  }
   0xb   :  { %s48_s22 = sshll.u32 %s2436_s21, 4  ;;  %s72_s24 = sshll.u32 %s2437_s23, 4  ;;  %s49_s22 = int_to_ptr.vmem [resolvable:$true] %s48_s22  ;;  %s2541_s24 = int_to_ptr.vmem [resolvable:$true] %s72_s24 }
   0xc   :  { %s2110_s27 = scalar_lea.hbm %s2864_s1, 256 }
   0xd   :  { %p2111_p0 = scmp.ne.s32.totalorder %s2864_s1, %s2110_s27  ;;  %p2114_p1 = scmp.lt.u32.totalorder %s2110_s27, %s2864_s1 }
   0xf   :  { %p2116_p2 = pnand %p2114_p1, %p2111_p0 }
  0x11   :  { %2119 = shalt.err (!%p2116_p2)
}
  0x12   :  { %s2120_s17 = scalar_lea.vmem %s49_s22, 256  ;;  %p2125_p4 = scmp.lt.s32.totalorder %s49_s22, %s49_s22 }
  0x13   :  { %p2121_p3 = scmp.ne.s32.totalorder %s49_s22, %s2120_s17  ;;  %p2126_p5 = scmp.lt.s32.totalorder %s2120_s17, %s2120_s17 }
  0x15   :  { %p2127_p6 = por %p2126_p5, %p2125_p4 }
  0x17   :  { %p2128_p7 = pnand %p2127_p6, %p2121_p3 }
  0x19   :  { %2131 = shalt.err (!%p2128_p7)
}
  0x1a   :  { %s2438_s18 = smov 64   ;;  %s2439_s19 = smov 4  }
  0x1b   :  { %54 = dma.hbm_to_vmem [thread:$0]  %s2864_s1, 256, %s49_s22, [#allocation6], %s2438_s18, %s2438_s18, %s2439_s19  }
  0x1c   :  { %s2132_s26 = scalar_lea.hbm %s2866_s3, 128 }
  0x1d   :  { %p2133_p8 = scmp.ne.s32.totalorder %s2866_s3, %s2132_s26  ;;  %p2136_p9 = scmp.lt.u32.totalorder %s2132_s26, %s2866_s3 }
  0x1f   :  { %p2138_p10 = pnand %p2136_p9, %p2133_p8 }
  0x21   :  { %2141 = shalt.err (!%p2138_p10)
}
  0x22   :  { %s2142_s0 = scalar_lea.vmem %s2541_s24, 128  ;;  %p2147_p12 = scmp.lt.s32.totalorder %s2541_s24, %s2541_s24 }
  0x23   :  { %p2143_p11 = scmp.ne.s32.totalorder %s2541_s24, %s2142_s0  ;;  %p2148_p13 = scmp.lt.s32.totalorder %s2142_s0, %s2142_s0 }
  0x25   :  { %p2149_p0 = por %p2148_p13, %p2147_p12 }
  0x27   :  { %p2150_p1 = pnand %p2149_p0, %p2143_p11 }
  0x29   :  { %2153 = shalt.err (!%p2150_p1)
}
  0x2a   :  { %78 = dma.hbm_to_vmem [thread:$0]  %s2866_s3, 128, %s2541_s24, [#allocation9], %s2438_s18, %s2438_s18, %s2439_s19  }
  0x2b   :  { %s2440_s17 = smov [#allocation11]   ;;  %s2441_s21 = smov [#allocation14]  }
  0x2c   :  { %s96_s20 = sshll.u32 %s2440_s17, 4  ;;  %s120_s23 = sshll.u32 %s2441_s21, 4  ;;  %s97_s20 = int_to_ptr.vmem [resolvable:$true] %s96_s20  ;;  %s2578_s23 = int_to_ptr.vmem [resolvable:$true] %s120_s23 }
  0x2d   :  { %s2154_s27 = scalar_lea.hbm %s2868_s5, 2048 }
  0x2e   :  { %p2155_p2 = scmp.ne.s32.totalorder %s2868_s5, %s2154_s27  ;;  %p2158_p3 = scmp.lt.u32.totalorder %s2154_s27, %s2868_s5 }
  0x30   :  { %p2160_p4 = pnand %p2158_p3, %p2155_p2 }
  0x32   :  { %2163 = shalt.err (!%p2160_p4)
}
  0x33   :  { %s2164_s3 = scalar_lea.vmem %s97_s20, 2048  ;;  %p2169_p6 = scmp.lt.s32.totalorder %s97_s20, %s97_s20 }
  0x34   :  { %p2165_p5 = scmp.ne.s32.totalorder %s97_s20, %s2164_s3  ;;  %p2170_p7 = scmp.lt.s32.totalorder %s2164_s3, %s2164_s3 }
  0x36   :  { %p2171_p8 = por %p2170_p7, %p2169_p6 }
  0x38   :  { %p2172_p9 = pnand %p2171_p8, %p2165_p5 }
  0x3a   :  { %2175 = shalt.err (!%p2172_p9)
}
  0x3b   :  { %102 = dma.hbm_to_vmem [thread:$0]  %s2868_s5, 2048, %s97_s20, [#allocation12], %s2438_s18, %s2438_s18, %s2439_s19  }
  0x3c   :  { %s2176_s21 = scalar_lea.hbm %s2870_s7, 2048 }
  0x3d   :  { %p2177_p10 = scmp.ne.s32.totalorder %s2870_s7, %s2176_s21  ;;  %p2180_p11 = scmp.lt.u32.totalorder %s2176_s21, %s2870_s7 }
  0x3f   :  { %p2182_p12 = pnand %p2180_p11, %p2177_p10 }
  0x41   :  { %2185 = shalt.err (!%p2182_p12)
}
  0x42   :  { %s2186_s29 = scalar_lea.vmem %s2578_s23, 2048  ;;  %p2191_p0 = scmp.lt.s32.totalorder %s2578_s23, %s2578_s23 }
  0x43   :  { %p2187_p13 = scmp.ne.s32.totalorder %s2578_s23, %s2186_s29  ;;  %p2192_p1 = scmp.lt.s32.totalorder %s2186_s29, %s2186_s29 }
  0x45   :  { %p2193_p2 = por %p2192_p1, %p2191_p0 }
  0x47   :  { %p2194_p3 = pnand %p2193_p2, %p2187_p13 }
  0x49   :  { %2197 = shalt.err (!%p2194_p3)
}
  0x4a   :  { %126 = dma.hbm_to_vmem [thread:$0]  %s2870_s7, 2048, %s2578_s23, [#allocation15], %s2438_s18, %s2438_s18, %s2439_s19  }
  0x4b   :  { %s2442_s30 = smov [#allocation17]   ;;  %s2443_s3 = smov [#allocation2]  }
  0x4c   :  { %s146_s0 = sshll.u32 %s2442_s30, 4  ;;  %s36_s24 = sshll.u32 %s2443_s3, 4  ;;  %s147_s0 = int_to_ptr.vmem [resolvable:$true] %s146_s0  ;;  %s2615_s24 = int_to_ptr.vmem [resolvable:$true] %s36_s24 }
  0x4d   :  { %s2198_s17 = scalar_lea.hbm %s2873_s10, 1024 }
  0x4e   :  { %p2199_p4 = scmp.ne.s32.totalorder %s2873_s10, %s2198_s17  ;;  %p2202_p5 = scmp.lt.u32.totalorder %s2198_s17, %s2873_s10 }
  0x50   :  { %p2204_p6 = pnand %p2202_p5, %p2199_p4 }
  0x52   :  { %2207 = shalt.err (!%p2204_p6)
}
  0x53   :  { %s2208_s7 = scalar_lea.vmem %s147_s0, 1024  ;;  %p2213_p8 = scmp.lt.s32.totalorder %s147_s0, %s147_s0 }
  0x54   :  { %p2209_p7 = scmp.ne.s32.totalorder %s147_s0, %s2208_s7  ;;  %p2214_p9 = scmp.lt.s32.totalorder %s2208_s7, %s2208_s7 }
  0x56   :  { %p2215_p10 = por %p2214_p9, %p2213_p8 }
  0x58   :  { %p2216_p11 = pnand %p2215_p10, %p2209_p7 }
  0x5a   :  { %2219 = shalt.err (!%p2216_p11)
}
  0x5b   :  { %152 = dma.hbm_to_vmem [thread:$0]  %s2873_s10, 1024, %s147_s0, [#allocation18], %s2438_s18, %s2438_s18, %s2439_s19  }
  0x5c   :  { %s2882_s20 = sld [smem:[#allocation34_spill]] }
  0x62   :  { %s2220_s30 = scalar_lea.hbm %s2882_s20, 256 }
  0x63   :  { %p2221_p12 = scmp.ne.s32.totalorder %s2882_s20, %s2220_s30  ;;  %p2224_p13 = scmp.lt.u32.totalorder %s2220_s30, %s2882_s20 }
  0x65   :  { %p2226_p0 = pnand %p2224_p13, %p2221_p12 }
  0x67   :  { %2229 = shalt.err (!%p2226_p0)
}
  0x68   :  { %s2230_s21 = scalar_lea.vmem %s2615_s24, 256  ;;  %p2235_p2 = scmp.lt.s32.totalorder %s2615_s24, %s2615_s24 }
  0x69   :  { %p2231_p1 = scmp.ne.s32.totalorder %s2615_s24, %s2230_s21  ;;  %p2236_p3 = scmp.lt.s32.totalorder %s2230_s21, %s2230_s21 }
  0x6b   :  { %p2237_p4 = por %p2236_p3, %p2235_p2 }
  0x6d   :  { %p2238_p5 = pnand %p2237_p4, %p2231_p1 }
  0x6f   :  { %2241 = shalt.err (!%p2238_p5)
}
  0x70   :  { %42 = dma.hbm_to_vmem [thread:$0]  %s2882_s20, 256, %s2615_s24, [#allocation3], %s2438_s18, %s2438_s18, %s2439_s19  }
  0x71   :  { %s2444_s25 = smov [#allocation7]   ;;  %s2445_s27 = smov [#allocation10]  }
  0x72   :  { %s60_s26 = sshll.u32 %s2444_s25, 4  ;;  %s84_s7 = sshll.u32 %s2445_s27, 4  ;;  %s61_s26 = int_to_ptr.vmem [resolvable:$true] %s60_s26  ;;  %s2652_s7 = int_to_ptr.vmem [resolvable:$true] %s84_s7 }
  0x73   :  { %s2242_s29 = scalar_lea.hbm %s2865_s2, 128 }
  0x74   :  { %p2243_p6 = scmp.ne.s32.totalorder %s2865_s2, %s2242_s29  ;;  %p2246_p7 = scmp.lt.u32.totalorder %s2242_s29, %s2865_s2 }
  0x76   :  { %p2248_p8 = pnand %p2246_p7, %p2243_p6 }
  0x78   :  { %2251 = shalt.err (!%p2248_p8)
}
  0x79   :  { %s2252_s24 = scalar_lea.vmem %s61_s26, 128  ;;  %p2257_p10 = scmp.lt.s32.totalorder %s61_s26, %s61_s26 }
  0x7a   :  { %p2253_p9 = scmp.ne.s32.totalorder %s61_s26, %s2252_s24  ;;  %p2258_p11 = scmp.lt.s32.totalorder %s2252_s24, %s2252_s24 }
  0x7c   :  { %p2259_p12 = por %p2258_p11, %p2257_p10 }
  0x7e   :  { %p2260_p13 = pnand %p2259_p12, %p2253_p9 }
  0x80   :  { %2263 = shalt.err (!%p2260_p13)
}
  0x81   :  { %66 = dma.hbm_to_vmem [thread:$0]  %s2865_s2, 128, %s61_s26, [#allocation6], %s2438_s18, %s2438_s18, %s2439_s19  }
  0x82   :  { %s2264_s10 = scalar_lea.hbm %s2867_s4, 2048 }
  0x83   :  { %p2265_p0 = scmp.ne.s32.totalorder %s2867_s4, %s2264_s10  ;;  %p2268_p1 = scmp.lt.u32.totalorder %s2264_s10, %s2867_s4 }
  0x85   :  { %p2270_p2 = pnand %p2268_p1, %p2265_p0 }
  0x87   :  { %2273 = shalt.err (!%p2270_p2)
}
  0x88   :  { %s2274_s28 = scalar_lea.vmem %s2652_s7, 2048  ;;  %p2279_p4 = scmp.lt.s32.totalorder %s2652_s7, %s2652_s7 }
  0x89   :  { %p2275_p3 = scmp.ne.s32.totalorder %s2652_s7, %s2274_s28  ;;  %p2280_p5 = scmp.lt.s32.totalorder %s2274_s28, %s2274_s28 }
  0x8b   :  { %p2281_p6 = por %p2280_p5, %p2279_p4 }
  0x8d   :  { %p2282_p7 = pnand %p2281_p6, %p2275_p3 }
  0x8f   :  { %2285 = shalt.err (!%p2282_p7)
}
  0x90   :  { %90 = dma.hbm_to_vmem [thread:$0]  %s2867_s4, 2048, %s2652_s7, [#allocation9], %s2438_s18, %s2438_s18, %s2439_s19  }
  0x91   :  { %s2446_s29 = smov [#allocation13]   ;;  %s2286_s1 = scalar_lea.hbm %s2869_s6, 512 }
  0x92   :  { %s108_s5 = sshll.u32 %s2446_s29, 4  ;;  %p2287_p8 = scmp.ne.s32.totalorder %s2869_s6, %s2286_s1  ;;  %s109_s5 = int_to_ptr.vmem [resolvable:$true] %s108_s5 }
  0x93   :  { %p2290_p9 = scmp.lt.u32.totalorder %s2286_s1, %s2869_s6 }
  0x95   :  { %p2292_p10 = pnand %p2290_p9, %p2287_p8 }
  0x97   :  { %2295 = shalt.err (!%p2292_p10)
}
  0x98   :  { %s2296_s21 = scalar_lea.vmem %s109_s5, 512  ;;  %p2301_p12 = scmp.lt.s32.totalorder %s109_s5, %s109_s5 }
  0x99   :  { %p2297_p11 = scmp.ne.s32.totalorder %s109_s5, %s2296_s21  ;;  %p2302_p13 = scmp.lt.s32.totalorder %s2296_s21, %s2296_s21 }
  0x9b   :  { %p2303_p0 = por %p2302_p13, %p2301_p12 }
  0x9d   :  { %p2304_p1 = pnand %p2303_p0, %p2297_p11 }
  0x9f   :  { %2307 = shalt.err (!%p2304_p1)
}
  0xa0   :  { %s2447_s4 = smov 128   ;;  %s2448_s7 = smov 8  }
  0xa1   :  { %114 = dma.hbm_to_vmem [thread:$0]  %s2869_s6, 512, %s109_s5, [#allocation12], %s2447_s4, %s2447_s4, %s2448_s7  }
  0xa2   :  { %s2449_s25 = smov [#allocation16]   ;;  %s2450_s23 = smov [#allocation19]  }
  0xa3   :  { %s132_s27 = sshll.u32 %s2449_s25, 4  ;;  %s158_s28 = sshll.u32 %s2450_s23, 4  ;;  %s133_s27 = int_to_ptr.vmem [resolvable:$true] %s132_s27  ;;  %s159_s28 = int_to_ptr.vmem [resolvable:$true] %s158_s28 }
  0xa4   :  { %s2308_s29 = scalar_lea.hbm %s2871_s8, 2048 }
  0xa5   :  { %p2309_p2 = scmp.ne.s32.totalorder %s2871_s8, %s2308_s29  ;;  %p2312_p3 = scmp.lt.u32.totalorder %s2308_s29, %s2871_s8 }
  0xa7   :  { %p2314_p4 = pnand %p2312_p3, %p2309_p2 }
  0xa9   :  { %2317 = shalt.err (!%p2314_p4)
}
  0xaa   :  { %s2318_s6 = scalar_lea.vmem %s133_s27, 2048  ;;  %p2323_p6 = scmp.lt.s32.totalorder %s133_s27, %s133_s27 }
  0xab   :  { %p2319_p5 = scmp.ne.s32.totalorder %s133_s27, %s2318_s6  ;;  %p2324_p7 = scmp.lt.s32.totalorder %s2318_s6, %s2318_s6 }
  0xad   :  { %p2325_p8 = por %p2324_p7, %p2323_p6 }
  0xaf   :  { %p2326_p9 = pnand %p2325_p8, %p2319_p5 }
  0xb1   :  { %2329 = shalt.err (!%p2326_p9)
}
  0xb2   :  { %138 = dma.hbm_to_vmem [thread:$0]  %s2871_s8, 2048, %s133_s27, [#allocation15], %s2438_s18, %s2438_s18, %s2439_s19  }
  0xb3   :  { %s2330_s21 = scalar_lea.hbm %s2874_s11, 1024 }
  0xb4   :  { %p2331_p10 = scmp.ne.s32.totalorder %s2874_s11, %s2330_s21  ;;  %p2334_p11 = scmp.lt.u32.totalorder %s2330_s21, %s2874_s11 }
  0xb6   :  { %p2336_p12 = pnand %p2334_p11, %p2331_p10 }
  0xb8   :  { %2339 = shalt.err (!%p2336_p12)
}
  0xb9   :  { %s2340_s2 = scalar_lea.vmem %s159_s28, 1024  ;;  %p2345_p0 = scmp.lt.s32.totalorder %s159_s28, %s159_s28 }
  0xba   :  { %p2341_p13 = scmp.ne.s32.totalorder %s159_s28, %s2340_s2  ;;  %p2346_p1 = scmp.lt.s32.totalorder %s2340_s2, %s2340_s2 }
  0xbc   :  { %p2347_p2 = por %p2346_p1, %p2345_p0 }
  0xbe   :  { %p2348_p3 = pnand %p2347_p2, %p2341_p13 }
  0xc0   :  { %2351 = shalt.err (!%p2348_p3)
}
  0xc1   :  { %164 = dma.hbm_to_vmem [thread:$0]  %s2874_s11, 1024, %s159_s28, [#allocation18], %s2438_s18, %s2438_s18, %s2439_s19  }
  0xc2   :  { %s2451_s26 = smov [#allocation20]   ;;  %s2352_s1 = scalar_lea.hbm %s2876_s13, 1024 }
  0xc3   :  { %s172_s29 = sshll.u32 %s2451_s26, 4  ;;  %p2353_p4 = scmp.ne.s32.totalorder %s2876_s13, %s2352_s1  ;;  %s173_s29 = int_to_ptr.vmem [resolvable:$true] %s172_s29 }
  0xc4   :  { %p2356_p5 = scmp.lt.u32.totalorder %s2352_s1, %s2876_s13 }
  0xc6   :  { %p2358_p6 = pnand %p2356_p5, %p2353_p4 }
  0xc8   :  { %2361 = shalt.err (!%p2358_p6)
}
  0xc9   :  { %s2362_s22 = scalar_lea.vmem %s173_s29, 1024  ;;  %p2367_p8 = scmp.lt.s32.totalorder %s173_s29, %s173_s29 }
  0xca   :  { %p2363_p7 = scmp.ne.s32.totalorder %s173_s29, %s2362_s22  ;;  %p2368_p9 = scmp.lt.s32.totalorder %s2362_s22, %s2362_s22 }
  0xcc   :  { %p2369_p10 = por %p2368_p9, %p2367_p8 }
  0xce   :  { %p2370_p11 = pnand %p2369_p10, %p2363_p7 }
  0xd0   :  { %2373 = shalt.err (!%p2370_p11)
}
  0xd1   :  { %178 = dma.hbm_to_vmem [thread:$0]  %s2876_s13, 1024, %s173_s29, [#allocation21], %s2438_s18, %s2438_s18, %s2439_s19  }
  0xd2   :  { %2418 = dma.done.wait [#allocation3], 256  }
  0xd3   :  { %2419 = vsyncadd [#allocation3], 4294967040 }
  0xd4   :  { %2420 = dma.done.wait [#allocation6], 384  }
  0xd5   :  { %2421 = vsyncadd [#allocation6], 4294966912 }
  0xd6   :  { %2422 = dma.done.wait [#allocation9], 2176  }
  0xd7   :  { %2423 = vsyncadd [#allocation9], 4294965120 }
  0xd8   :  { %2424 = dma.done.wait [#allocation12], 2560  }
  0xd9   :  { %2425 = vsyncadd [#allocation12], 4294964736 }
  0xda   :  { %2426 = dma.done.wait [#allocation15], 4096  }
  0xdb   :  { %2427 = vsyncadd [#allocation15], 4294963200 }
  0xdc   :  { %2428 = dma.done.wait [#allocation18], 2048  }
  0xdd   :  { %2429 = vsyncadd [#allocation18], 4294965248 }
  0xde   :  { %2430 = dma.done.wait [#allocation21], 1024  }
  0xdf   :  { %2431 = vsyncadd [#allocation21], 4294966272  ;;  %v2749_v0 = vld [vmem:[#allocation5] sm:$0xff]   ;;  %v2751_v1 = vld [vmem:[#allocation5 + $0x8] sm:$0xff]   ;;  %vm269_vm0 = vcmask 261120   ;;  %vm2453_vm1 = vmmov 0  }
  0xe0   :  { %v2753_v2 = vld [vmem:[#allocation2] sm:$0xff]   ;;  %1902 = vmatprep.subr.bf16.mxu0 %v2749_v0  ;;  %v2018_v3 = vld [vmem:[#allocation11 + $0x40] sm:$0xff]   ;;  %v2760_v5 = vld [vmem:[#allocation2 + $0x8] sm:$0xff]   ;;  %v337_v31 = vunpack.c.l.bf16 %v2749_v0  ;;  %v338_v32 = vunpack.c.h.bf16 %v2749_v0  ;;  %v339_v41 = vunpack.c.l.bf16 %v2751_v1  ;;  %v340_v42 = vunpack.c.h.bf16 %v2751_v1  ;;  %s2454_s2 = smov [#allocation23]  }
  0xe1   :  { %1906 = vmatprep.mubr.msk.bf16.mxu0 %vm269_vm0, %v2753_v2  ;;  %1903 = vmatpush3.bf16.msra.mxu0 %v2749_v0  ;;  %v2019_v4 = vld [vmem:[#allocation11] sm:$0xff]   ;;  %v2021_v7 = vld [vmem:[#allocation11 + $0x48] sm:$0xff]   ;;  %v2025_v11 = vld [vmem:[#allocation11 + $0x50] sm:$0xff]   ;;  %s1623_s8 = sshll.u32 %s2454_s2, 4  ;;  %s1624_s8 = int_to_ptr.vmem [resolvable:$true] %s1623_s8 }
  0xe2   :  { %1904 = vmatprep.subr.bf16.mxu0 %v2751_v1  ;;  %1753 = vmatprep.subr.bf16.mxu1 %v2018_v3  ;;  %v2020_v6 = vld [vmem:[#allocation10 + $0x40] sm:$0xff]   ;;  %v2023_v9 = vld [vmem:[#allocation11 + $0x8] sm:$0xff]   ;;  %v2027_v13 = vld [vmem:[#allocation11 + $0x10] sm:$0xff]   ;;  %v345_v36 = vmul.f32 0.0, %v337_v31  ;;  %v346_v37 = vmul.f32 0.0, %v338_v32  ;;  %v343_v43 = vmul.f32 0.0, %v339_v41  ;;  %p2379_p13 = scmp.lt.s32.totalorder %s1624_s8, %s1624_s8 }
  0xe3   :  { %1754 = vmatpush3.bf16.msra.mxu1 %v2019_v4  ;;  %v2022_v8 = vld [vmem:[#allocation10] sm:$0xff]   ;;  %v2024_v10 = vld [vmem:[#allocation10 + $0x48] sm:$0xff]   ;;  %v2028_v14 = vld [vmem:[#allocation10 + $0x50] sm:$0xff]   ;;  %v344_v44 = vmul.f32 0.0, %v340_v42  ;;  %s2374_s27 = scalar_lea.vmem %s1624_s8, 512 }
  0xe4   :  { %1755 = vmatprep.subr.bf16.mxu1 %v2021_v7  ;;  %v2026_v12 = vld [vmem:[#allocation10 + $0x8] sm:$0xff]   ;;  %v2029_v15 = vld [vmem:[#allocation11 + $0x58] sm:$0xff]   ;;  %v2030_v16 = vld [vmem:[#allocation10 + $0x10] sm:$0xff]   ;;  %v350_v38 = vpack.c.bf16 %v346_v37, %v345_v36  ;;  %p2375_p12 = scmp.ne.s32.totalorder %s1624_s8, %s2374_s27  ;;  %p2380_p0 = scmp.lt.s32.totalorder %s2374_s27, %s2374_s27 }
  0xe5   :  { %1905 = vmatpush3.bf16.msra.mxu0 %v2751_v1  ;;  %v2031_v17 = vld [vmem:[#allocation11 + $0x18] sm:$0xff]   ;;  %v2033_v19 = vld [vmem:[#allocation11 + $0x60] sm:$0xff]   ;;  %v2037_v23 = vld [vmem:[#allocation11 + $0x68] sm:$0xff]   ;;  %v351_v45 = vpack.c.bf16 %v344_v44, %v343_v43 }
  0xe6   :  { %1781 = vmatprep.subr.bf16.mxu0 %v2020_v6  ;;  %v2032_v18 = vld [vmem:[#allocation10 + $0x58] sm:$0xff]   ;;  %v2035_v21 = vld [vmem:[#allocation11 + $0x20] sm:$0xff]   ;;  %v2039_v25 = vld [vmem:[#allocation11 + $0x28] sm:$0xff]   ;;  %545 = vmatprep.mubr.bf16.mxu1 %v350_v38  ;;  %p2381_p1 = por %p2380_p0, %p2379_p13 }
  0xe7   :  { %1756 = vmatpush3.bf16.msra.mxu1 %v2023_v9  ;;  %v2034_v20 = vld [vmem:[#allocation10 + $0x18] sm:$0xff]   ;;  %v2036_v22 = vld [vmem:[#allocation10 + $0x60] sm:$0xff]   ;;  %v2040_v26 = vld [vmem:[#allocation10 + $0x68] sm:$0xff]  }
  0xe8   :  { %1907 = vmatmul.mubr.msk.bf16.vlgmr.msra.gmra.mrb[0].mxu0 %vm269_vm0, %v2760_v5  ;;  %1757 = vmatprep.subr.bf16.mxu1 %v2025_v11  ;;  %v2038_v24 = vld [vmem:[#allocation10 + $0x20] sm:$0xff]   ;;  %v2041_v27 = vld [vmem:[#allocation11 + $0x70] sm:$0xff]   ;;  %v2042_v28 = vld [vmem:[#allocation10 + $0x28] sm:$0xff]   ;;  %p2382_p2 = pnand %p2381_p1, %p2375_p12 }
  0xe9   :  { %1782 = vmatpush3.bf16.msra.mxu0 %v2022_v8  ;;  %v2043_v29 = vld [vmem:[#allocation11 + $0x30] sm:$0xff]   ;;  %v2045_v33 = vld [vmem:[#allocation11 + $0x78] sm:$0xff]   ;;  %v2050_v46 = vld [vmem:[#allocation16 + $0x40] sm:$0xff]  }
  0xea   :  { %1783 = vmatprep.subr.bf16.mxu0 %v2024_v10  ;;  %v2044_v30 = vld [vmem:[#allocation10 + $0x70] sm:$0xff]   ;;  %v2047_v35 = vld [vmem:[#allocation11 + $0x38] sm:$0xff]   ;;  %v2051_v59 = vld [vmem:[#allocation16] sm:$0xff]  }
  0xeb   :  { %1758 = vmatpush3.bf16.msra.mxu1 %v2027_v13  ;;  %v2046_v34 = vld [vmem:[#allocation10 + $0x30] sm:$0xff]   ;;  %v2048_v39 = vld [vmem:[#allocation10 + $0x78] sm:$0xff]   ;;  %v2052_v60 = vld [vmem:[#allocation16 + $0x48] sm:$0xff]  }
  0xec   :  { %1759 = vmatprep.subr.bf16.mxu1 %v2029_v15  ;;  %v2049_v40 = vld [vmem:[#allocation10 + $0x38] sm:$0xff]   ;;  %v2053_v61 = vld [vmem:[#allocation16 + $0x8] sm:$0xff]   ;;  %v2054_v62 = vld [vmem:[#allocation16 + $0x50] sm:$0xff]  }
  0xed   :  { %1784 = vmatpush3.bf16.msra.mxu0 %v2026_v12  ;;  %v2055_v63 = vld [vmem:[#allocation16 + $0x10] sm:$0xff]   ;;  %v2056_v4 = vld [vmem:[#allocation16 + $0x58] sm:$0xff]   ;;  %v2058_v9 = vld [vmem:[#allocation16 + $0x60] sm:$0xff]  }
  0xee   :  { %1785 = vmatprep.subr.bf16.mxu0 %v2028_v14  ;;  %v2057_v7 = vld [vmem:[#allocation16 + $0x18] sm:$0xff]   ;;  %v2059_v10 = vld [vmem:[#allocation16 + $0x20] sm:$0xff]   ;;  %v2060_v14 = vld [vmem:[#allocation16 + $0x68] sm:$0xff]  }
  0xef   :  { %1760 = vmatpush3.bf16.msra.mxu1 %v2031_v17  ;;  %v708_v31 = vld [vmem:[#allocation13 + $0x8] sm:$0xff]  ;;  %v709_v41 = vld [vmem:[#allocation13 + $0x10] sm:$0xff] }
  0xf0   :  { %1761 = vmatprep.subr.bf16.mxu1 %v2033_v19  ;;  %v2062_v19 = vld [vmem:[#allocation16 + $0x70] sm:$0xff]  }
  0xf1   :  { %1786 = vmatpush3.bf16.msra.mxu0 %v2030_v16  ;;  %v2061_v16 = vld [vmem:[#allocation16 + $0x28] sm:$0xff]  }
  0xf2   :  { %1787 = vmatprep.subr.bf16.mxu0 %v2032_v18 }
  0xf3   :  { %1762 = vmatpush3.bf16.msra.mxu1 %v2035_v21  ;;  %v2064_v21 = vld [vmem:[#allocation16 + $0x78] sm:$0xff]  }
  0xf4   :  { %1763 = vmatprep.subr.bf16.mxu1 %v2037_v23 }
  0xf5   :  { %1788 = vmatpush3.bf16.msra.mxu0 %v2034_v20  ;;  %v2063_v20 = vld [vmem:[#allocation16 + $0x30] sm:$0xff]  }
  0xf6   :  { %1789 = vmatprep.subr.bf16.mxu0 %v2036_v22  ;;  %v2065_v22 = vld [vmem:[#allocation16 + $0x38] sm:$0xff]  }
  0xf7   :  { %1764 = vmatpush3.bf16.msra.mxu1 %v2039_v25 }
  0xf8   :  { %1765 = vmatprep.subr.bf16.mxu1 %v2041_v27  ;;  %v707_v27 = vld [vmem:[#allocation13] sm:$0xff] }
  0xf9   :  { %1790 = vmatpush3.bf16.msra.mxu0 %v2038_v24 }
  0xfa   :  { %1791 = vmatprep.subr.bf16.mxu0 %v2040_v26 }
  0xfb   :  { %1766 = vmatpush3.bf16.msra.mxu1 %v2043_v29 }
  0xfc   :  { %1767 = vmatprep.subr.bf16.mxu1 %v2045_v33 }
  0xfd   :  { %1792 = vmatpush3.bf16.msra.mxu0 %v2042_v28 }
  0xfe   :  { %1793 = vmatprep.subr.bf16.mxu0 %v2044_v30 }
  0xff   :  { %1768 = vmatpush3.bf16.msra.mxu1 %v2047_v35 }
 0x101   :  { %1794 = vmatpush3.bf16.msra.mxu0 %v2046_v34 }
 0x102   :  { %1795 = vmatprep.subr.bf16.mxu0 %v2048_v39  ;;  %546 = vmatmul.mubr.bf16.vlgmr.msra.gmra.mrb[0].mxu1 %v2749_v0 }
 0x103   :  { %553 = vmatprep.mubr.bf16.mxu1 %v2751_v1 }
 0x105   :  { %1796 = vmatpush3.bf16.msra.mxu0 %v2049_v40 }
 0x106   :  { %1813 = vmatprep.subr.bf16.mxu0 %v2050_v46  ;;  %v710_v46 = vld [vmem:[#allocation13 + $0x18] sm:$0xff] }
 0x10a   :  { %554 = vmatmul.mubr.bf16.gmra.mrb[4].mxu1 %v351_v45 }
 0x10b   :  { %1914 = vmatprep.mubr.msk.bf16.mxu1 %vm269_vm0, %v2753_v2 }
 0x1bb   :  { %v1908_v47 = vpop.f32.mrb[0].mxu0 }
 0x1bc   :  { %v310_v48 = vpop.f32.mrb[1].mxu0  ;;  %v327_v50 = vmul.f32 0.0, %v1908_v47 }
 0x1bd   :  { %v1909_v49 = vpop.f32.mrb[2].mxu0  ;;  %v329_v54 = vmul.f32 0.0, %v310_v48 }
 0x1be   :  { %v328_v51 = vmul.f32 0.0, %v1909_v49  ;;  %v336_v52 = vpack.c.bf16 %v1909_v49, %v1908_v47  ;;  %v313_v53 = vpop.f32.mrb[3].mxu0 }
 0x1bf   :  { %v330_v55 = vmul.f32 0.0, %v313_v53  ;;  %v333_v56 = vpack.c.bf16 %v313_v53, %v310_v48 }
 0x1c0   :  { %v335_v57 = vpack.c.bf16 %v328_v51, %v327_v50 }
 0x1c1   :  { %v334_v58 = vpack.c.bf16 %v330_v55, %v329_v54 }
 0x1c3   :  { %690 = vmatprep.mubr.bf16.mxu0 %v334_v58  ;;  %v2066_v58 = vld [vmem:[#allocation14 + $0x40] sm:$0xff]  }
 0x1c4   :  { %691 = vmatmul.mubr.bf16.vlgmr.msra.gmra.mrb[4].mxu0 %v333_v56 }
 0x1c5   :  { %698 = vmatprep.mubr.bf16.mxu0 %v336_v52  ;;  %1814 = vmatpush3.bf16.msra.mxu0 %v2051_v59 }
 0x1c6   :  { %1815 = vmatprep.subr.bf16.mxu0 %v2052_v60 }
 0x1c9   :  { %1816 = vmatpush3.bf16.msra.mxu0 %v2053_v61  ;;  %v2067_v61 = vld [vmem:[#allocation14] sm:$0xff]  }
 0x1ca   :  { %1817 = vmatprep.subr.bf16.mxu0 %v2054_v62 }
 0x1cc   :  { %699 = vmatmul.mubr.bf16.gmra.mrb[8].mxu0 %v335_v57 }
 0x1cd   :  { %1818 = vmatpush3.bf16.msra.mxu0 %v2055_v63 }
 0x1ce   :  { %1819 = vmatprep.subr.bf16.mxu0 %v2056_v4  ;;  %v2071_v4 = vld [vmem:[#allocation14 + $0x10] sm:$0xff]  }
 0x1d1   :  { %1820 = vmatpush3.bf16.msra.mxu0 %v2057_v7  ;;  %v2073_v7 = vld [vmem:[#allocation14 + $0x18] sm:$0xff]  }
 0x1d2   :  { %1821 = vmatprep.subr.bf16.mxu0 %v2058_v9  ;;  %v2075_v9 = vld [vmem:[#allocation14 + $0x20] sm:$0xff]  }
 0x1d5   :  { %v1769_v0 = vpop.f32.mrb[0].mxu1  ;;  %1822 = vmatpush3.bf16.msra.mxu0 %v2059_v10  ;;  %v2076_v10 = vld [vmem:[#allocation14 + $0x68] sm:$0xff]  }
 0x1d6   :  { %v1770_v1 = vpop.f32.mrb[1].mxu1  ;;  %1823 = vmatprep.subr.bf16.mxu0 %v2060_v14  ;;  %v2081_v14 = vld [vmem:[#allocation14 + $0x38] sm:$0xff]  }
 0x1d7   :  { %v1771_v2 = vadd.f32 %v1770_v1, %v1769_v0  ;;  %v1772_v3 = vpop.f32.mrb[2].mxu1  ;;  %v2068_v0 = vld [vmem:[#allocation14 + $0x48] sm:$0xff]  }
 0x1d8   :  { %v1773_v6 = vpop.f32.mrb[3].mxu1 }
 0x1d9   :  { %v1774_v8 = vadd.f32 %v1773_v6, %v1772_v3  ;;  %1824 = vmatpush3.bf16.msra.mxu0 %v2061_v16  ;;  %v2070_v3 = vld [vmem:[#allocation14 + $0x50] sm:$0xff]   ;;  %v2072_v6 = vld [vmem:[#allocation14 + $0x58] sm:$0xff]  }
 0x1da   :  { %1825 = vmatprep.subr.bf16.mxu0 %v2062_v19 }
 0x1dd   :  { %v1775_v11 = vpop.f32.mrb[4].mxu1  ;;  %1826 = vmatpush3.bf16.msra.mxu0 %v2063_v20 }
 0x1de   :  { %v1776_v12 = vpop.f32.mrb[5].mxu1  ;;  %1827 = vmatprep.subr.bf16.mxu0 %v2064_v21 }
 0x1df   :  { %v1778_v13 = vpop.f32.mrb[6].mxu1  ;;  %v1777_v17 = vadd.f32 %v1776_v12, %v1775_v11  ;;  %v2078_v11 = vld [vmem:[#allocation14 + $0x70] sm:$0xff]  }
 0x1e0   :  { %v1779_v15 = vpop.f32.mrb[7].mxu1  ;;  %v2079_v12 = vld [vmem:[#allocation14 + $0x30] sm:$0xff]  }
 0x1e1   :  { %v1780_v18 = vadd.f32 %v1779_v15, %v1778_v13  ;;  %1828 = vmatpush3.bf16.msra.mxu0 %v2065_v22  ;;  %v2080_v13 = vld [vmem:[#allocation14 + $0x78] sm:$0xff]  }
 0x297   :  { %v1797_v23 = vpop.f32.mrb[4].mxu0 }
 0x298   :  { %v1798_v24 = vpop.f32.mrb[5].mxu0 }
 0x299   :  { %v1799_v25 = vadd.f32 %v1798_v24, %v1797_v23  ;;  %v1800_v26 = vpop.f32.mrb[6].mxu0 }
 0x29a   :  { %v1801_v28 = vpop.f32.mrb[7].mxu0 }
 0x29b   :  { %v693_v29 = vadd.f32 %v1799_v25, %v1771_v2  ;;  %v1802_v30 = vadd.f32 %v1801_v28, %v1800_v26  ;;  %v2069_v2 = vld [vmem:[#allocation14 + $0x8] sm:$0xff]  }
 0x29d   :  { %v711_v32 = vadd.f32 %v707_v27, %v693_v29  ;;  %v696_v33 = vadd.f32 %v1802_v30, %v1774_v8  ;;  %v2074_v8 = vld [vmem:[#allocation14 + $0x60] sm:$0xff]  }
 0x29f   :  { %v712_v34 = vadd.f32 %v708_v31, %v696_v33  ;;  %v1803_v35 = vpop.f32.mrb[8].mxu0  ;;  %v715_v37 = vmax.f32 %v711_v32, 0.0 }
 0x2a0   :  { %v1804_v36 = vpop.f32.mrb[9].mxu0 }
 0x2a1   :  { %v716_v38 = vmax.f32 %v712_v34, 0.0  ;;  %v1805_v39 = vadd.f32 %v1804_v36, %v1803_v35  ;;  %v1806_v40 = vpop.f32.mrb[10].mxu0 }
 0x2a2   :  { %v1807_v42 = vpop.f32.mrb[11].mxu0 }
 0x2a3   :  { %v719_v43 = vpack.c.bf16 %v716_v38, %v715_v37  ;;  %v701_v44 = vadd.f32 %v1805_v39, %v1777_v17  ;;  %v1808_v45 = vadd.f32 %v1807_v42, %v1806_v40  ;;  %v2452_v39 = vmov 0.0   ;;  %v2086_v40 = vld [vmem:[#allocation19] sm:$0xff]   ;;  %v2090_v42 = vld [vmem:[#allocation19 + $0x10] sm:$0xff]  }
 0x2a4   :  { %1918 = vmatprep.subr.bf16.mxu0 %v2452_v39 }
 0x2a5   :  { %v713_v47 = vadd.f32 %v709_v41, %v701_v44  ;;  %v704_v48 = vadd.f32 %v1808_v45, %v1780_v18  ;;  %1910 = vmatprep.subr.bf16.mxu1 %v719_v43  ;;  %v782_v49 = vunpack.c.l.bf16 %v719_v43  ;;  %v783_v50 = vunpack.c.h.bf16 %v719_v43  ;;  %v2088_v41 = vld [vmem:[#allocation19 + $0x8] sm:$0xff]   ;;  %v2094_v44 = vld [vmem:[#allocation19 + $0x20] sm:$0xff]  }
 0x2a6   :  { %1911 = vmatpush3.bf16.msra.mxu1 %v719_v43 }
 0x2a7   :  { %v714_v51 = vadd.f32 %v710_v46, %v704_v48  ;;  %v790_v52 = vmul.f32 0.0, %v782_v49  ;;  %v791_v53 = vmul.f32 0.0, %v783_v50  ;;  %v717_v54 = vmax.f32 %v713_v47, 0.0  ;;  %v1152_v49 = vld [vmem:[%s2872_s9] sm:$0xff] }
 0x2a9   :  { %v718_v55 = vmax.f32 %v714_v51, 0.0  ;;  %v795_v56 = vpack.c.bf16 %v791_v53, %v790_v52  ;;  %v1153_v53 = vld [vmem:[%s2872_s9 + $0x8] sm:$0xff] }
 0x2ab   :  { %v720_v57 = vpack.c.bf16 %v718_v55, %v717_v54  ;;  %990 = vmatprep.mubr.bf16.mxu0 %v795_v56 }
 0x2ac   :  { %991 = vmatmul.mubr.bf16.vlgmr.msra.gmra.mrb[12].mxu0 %v719_v43  ;;  %v2092_v43 = vld [vmem:[#allocation19 + $0x18] sm:$0xff]  }
 0x2ad   :  { %1912 = vmatprep.subr.bf16.mxu1 %v720_v57  ;;  %998 = vmatprep.mubr.bf16.mxu0 %v720_v57  ;;  %v784_v59 = vunpack.c.l.bf16 %v720_v57  ;;  %v785_v60 = vunpack.c.h.bf16 %v720_v57 }
 0x2ae   :  { %1913 = vmatpush3.bf16.msra.mxu1 %v720_v57 }
 0x2af   :  { %v788_v62 = vmul.f32 0.0, %v784_v59  ;;  %v789_v63 = vmul.f32 0.0, %v785_v60  ;;  %1841 = vmatprep.subr.bf16.mxu1 %v2066_v58 }
 0x2b1   :  { %1915 = vmatmul.mubr.msk.bf16.vlgmr.msra.gmra.mrb[8].mxu1 %vm269_vm0, %v2760_v5  ;;  %v796_v1 = vpack.c.bf16 %v789_v63, %v788_v62  ;;  %v2077_v5 = vld [vmem:[#allocation14 + $0x28] sm:$0xff]   ;;  %v1154_v62 = vld [vmem:[%s2872_s9 + $0x10] sm:$0xff] }
 0x2b2   :  { %1842 = vmatpush3.bf16.msra.mxu1 %v2067_v61 }
 0x2b3   :  { %1843 = vmatprep.subr.bf16.mxu1 %v2068_v0 }
 0x2b4   :  { %999 = vmatmul.mubr.bf16.gmra.mrb[16].mxu0 %v796_v1 }
 0x2b5   :  { %1922 = vmatprep.mubr.msk.bf16.mxu0 %vm2453_vm1, %v2452_v39 }
 0x2b6   :  { %1844 = vmatpush3.bf16.msra.mxu1 %v2069_v2  ;;  %v1155_v2 = vld [vmem:[%s2872_s9 + $0x18] sm:$0xff] }
 0x2b7   :  { %1845 = vmatprep.subr.bf16.mxu1 %v2070_v3 }
 0x2ba   :  { %1846 = vmatpush3.bf16.msra.mxu1 %v2071_v4 }
 0x2bb   :  { %1847 = vmatprep.subr.bf16.mxu1 %v2072_v6 }
 0x2be   :  { %1848 = vmatpush3.bf16.msra.mxu1 %v2073_v7 }
 0x2bf   :  { %1849 = vmatprep.subr.bf16.mxu1 %v2074_v8  ;;  %v2082_v8 = vld [vmem:[#allocation7] sm:$0xff]  }
 0x2c2   :  { %1850 = vmatpush3.bf16.msra.mxu1 %v2075_v9  ;;  %v2083_v9 = vld [vmem:[#allocation8] sm:$0xff]  }
 0x2c3   :  { %1851 = vmatprep.subr.bf16.mxu1 %v2076_v10  ;;  %v2084_v10 = vld [vmem:[#allocation17] sm:$0xff]  }
 0x2c6   :  { %1852 = vmatpush3.bf16.msra.mxu1 %v2077_v5  ;;  %v2085_v5 = vld [vmem:[#allocation17 + $0x8] sm:$0xff]  }
 0x2c7   :  { %1853 = vmatprep.subr.bf16.mxu1 %v2078_v11  ;;  %v2087_v11 = vld [vmem:[#allocation17 + $0x10] sm:$0xff]  }
 0x2ca   :  { %1854 = vmatpush3.bf16.msra.mxu1 %v2079_v12  ;;  %v2089_v12 = vld [vmem:[#allocation17 + $0x18] sm:$0xff]  }
 0x2cb   :  { %1855 = vmatprep.subr.bf16.mxu1 %v2080_v13  ;;  %v2091_v13 = vld [vmem:[#allocation17 + $0x20] sm:$0xff]  }
 0x2ce   :  { %1856 = vmatpush3.bf16.msra.mxu1 %v2081_v14  ;;  %v2093_v14 = vld [vmem:[#allocation17 + $0x28] sm:$0xff]  }
 0x2cf   :  { %1934 = vmatprep.subr.bf16.mxu1 %v2452_v39 }
 0x37f   :  { %v1829_v15 = vpop.f32.mrb[12].mxu0 }
 0x380   :  { %v1830_v16 = vpop.f32.mrb[13].mxu0 }
 0x381   :  { %v1831_v17 = vadd.f32 %v1830_v16, %v1829_v15  ;;  %v1832_v18 = vpop.f32.mrb[14].mxu0  ;;  %v2095_v15 = vld [vmem:[#allocation17 + $0x30] sm:$0xff]   ;;  %v2096_v16 = vld [vmem:[#allocation19 + $0x28] sm:$0xff]  }
 0x382   :  { %v1833_v19 = vpop.f32.mrb[15].mxu0 }
 0x383   :  { %v1834_v20 = vadd.f32 %v1833_v19, %v1832_v18  ;;  %v2098_v18 = vld [vmem:[#allocation19 + $0x30] sm:$0xff]   ;;  %v2099_v19 = vld [vmem:[#allocation19 + $0x38] sm:$0xff]  }
 0x384   :  { %v1916_v21 = vpop.f32.mrb[8].mxu1 }
 0x385   :  { %v755_v22 = vpop.f32.mrb[9].mxu1  ;;  %v772_v24 = vmul.f32 0.0, %v1916_v21 }
 0x386   :  { %v1917_v23 = vpop.f32.mrb[10].mxu1  ;;  %v774_v29 = vmul.f32 0.0, %v755_v22 }
 0x387   :  { %v773_v25 = vmul.f32 0.0, %v1917_v23  ;;  %v781_v26 = vpack.c.bf16 %v1917_v23, %v1916_v21  ;;  %v758_v27 = vpop.f32.mrb[11].mxu1  ;;  %v1835_v28 = vpop.f32.mrb[16].mxu0 }
 0x388   :  { %v775_v30 = vmul.f32 0.0, %v758_v27  ;;  %v778_v31 = vpack.c.bf16 %v758_v27, %v755_v22  ;;  %v1836_v32 = vpop.f32.mrb[17].mxu0 }
 0x389   :  { %v780_v33 = vpack.c.bf16 %v773_v25, %v772_v24  ;;  %v1837_v34 = vadd.f32 %v1836_v32, %v1835_v28  ;;  %v1838_v35 = vpop.f32.mrb[18].mxu0  ;;  %v2100_v28 = vld [vmem:[#allocation20] sm:$0xff]   ;;  %v2102_v32 = vld [vmem:[#allocation20 + $0x10] sm:$0xff]  }
 0x38a   :  { %v779_v36 = vpack.c.bf16 %v775_v30, %v774_v29  ;;  %v1839_v37 = vpop.f32.mrb[19].mxu0 }
 0x38b   :  { %v1840_v38 = vadd.f32 %v1839_v37, %v1838_v35  ;;  %v2105_v35 = vld [vmem:[#allocation20 + $0x28] sm:$0xff]   ;;  %v2107_v37 = vld [vmem:[#allocation20 + $0x38] sm:$0xff]  }
 0x38c   :  { %1135 = vmatprep.mubr.bf16.mxu1 %v779_v36  ;;  %v2106_v36 = vld [vmem:[#allocation20 + $0x30] sm:$0xff]  }
 0x38d   :  { %1136 = vmatmul.mubr.bf16.vlgmr.msra.gmra.mrb[12].mxu1 %v778_v31  ;;  %v2101_v31 = vld [vmem:[#allocation20 + $0x8] sm:$0xff]  }
 0x38e   :  { %1143 = vmatprep.mubr.bf16.mxu1 %v781_v26  ;;  %1935 = vmatpush3.bf16.msra.mxu1 %v2086_v40 }
 0x38f   :  { %1936 = vmatprep.subr.bf16.mxu1 %v2452_v39 }
 0x392   :  { %1937 = vmatpush3.bf16.msra.mxu1 %v2088_v41 }
 0x393   :  { %1938 = vmatprep.subr.bf16.mxu1 %v2452_v39 }
 0x395   :  { %1144 = vmatmul.mubr.bf16.gmra.mrb[16].mxu1 %v780_v33  ;;  %v2103_v33 = vld [vmem:[#allocation20 + $0x18] sm:$0xff]  }
 0x396   :  { %1950 = vmatprep.mubr.msk.bf16.mxu1 %vm2453_vm1, %v2452_v39  ;;  %1939 = vmatpush3.bf16.msra.mxu1 %v2090_v42 }
 0x397   :  { %1940 = vmatprep.subr.bf16.mxu1 %v2452_v39 }
 0x39a   :  { %1941 = vmatpush3.bf16.msra.mxu1 %v2092_v43 }
 0x39b   :  { %1942 = vmatprep.subr.bf16.mxu1 %v2452_v39 }
 0x39e   :  { %1943 = vmatpush3.bf16.msra.mxu1 %v2094_v44  ;;  %v1739_v44 = vld [vmem:[%s2875_s12] ss:$0 sm:$0xff] }
 0x39f   :  { %1944 = vmatprep.subr.bf16.mxu1 %v2452_v39 }
 0x3a2   :  { %1945 = vmatpush3.bf16.msra.mxu1 %v2096_v16 }
 0x3a3   :  { %1946 = vmatprep.subr.bf16.mxu1 %v2452_v39 }
 0x3a6   :  { %1947 = vmatpush3.bf16.msra.mxu1 %v2098_v18 }
 0x3a7   :  { %1948 = vmatprep.subr.bf16.mxu1 %v2452_v39 }
 0x3aa   :  { %1949 = vmatpush3.bf16.msra.mxu1 %v2099_v19 }
 0x3ab   :  { %1974 = vmatprep.subr.bf16.mxu1 %v2452_v39 }
 0x460   :  { %v1857_v45 = vpop.f32.mrb[12].mxu1 }
 0x461   :  { %v1858_v46 = vpop.f32.mrb[13].mxu1 }
 0x462   :  { %v1859_v47 = vadd.f32 %v1858_v46, %v1857_v45  ;;  %v1860_v48 = vpop.f32.mrb[14].mxu1 }
 0x463   :  { %v1861_v50 = vpop.f32.mrb[15].mxu1 }
 0x464   :  { %v1138_v51 = vadd.f32 %v1859_v47, %v1831_v17  ;;  %v1862_v52 = vadd.f32 %v1861_v50, %v1860_v48  ;;  %v2097_v17 = vld [vmem:[#allocation17 + $0x38] sm:$0xff]  }
 0x466   :  { %v1156_v54 = vadd.f32 %v1152_v49, %v1138_v51  ;;  %v1141_v55 = vadd.f32 %v1862_v52, %v1834_v20 }
 0x468   :  { %1160 = vst [vmem:[#allocation23] sm:$0xff] %v1156_v54  ;;  %v1157_v56 = vadd.f32 %v1153_v53, %v1141_v55  ;;  %v1863_v57 = vpop.f32.mrb[16].mxu1 }
 0x469   :  { %v1864_v58 = vpop.f32.mrb[17].mxu1 }
 0x46a   :  { %1161 = vst [vmem:[#allocation23 + $0x8] sm:$0xff] %v1157_v56  ;;  %v1164_v59 = vpack.c.bf16 %v1157_v56, %v1156_v54  ;;  %v1865_v60 = vadd.f32 %v1864_v58, %v1863_v57  ;;  %v1866_v61 = vpop.f32.mrb[18].mxu1 }
 0x46b   :  { %v1867_v63 = vpop.f32.mrb[19].mxu1 }
 0x46c   :  { %v1146_v0 = vadd.f32 %v1865_v60, %v1837_v34  ;;  %v1868_v1 = vadd.f32 %v1867_v63, %v1866_v61  ;;  %1919 = vmatpush3.bf16.msra.mxu0 %v1164_v59  ;;  %v2104_v34 = vld [vmem:[#allocation20 + $0x20] sm:$0xff]  }
 0x46d   :  { %1920 = vmatprep.subr.bf16.mxu0 %v2452_v39 }
 0x46e   :  { %v1158_v3 = vadd.f32 %v1154_v62, %v1146_v0  ;;  %v1149_v4 = vadd.f32 %v1868_v1, %v1840_v38 }
 0x470   :  { %1162 = vst [vmem:[#allocation23 + $0x10] sm:$0xff] %v1158_v3  ;;  %v1159_v6 = vadd.f32 %v1155_v2, %v1149_v4 }
 0x472   :  { %1163 = vst [vmem:[#allocation23 + $0x18] sm:$0xff] %v1159_v6  ;;  %v1165_v7 = vpack.c.bf16 %v1159_v6, %v1158_v3 }
 0x474   :  { %1921 = vmatpush3.bf16.msra.mxu0 %v1165_v7 }
 0x475   :  { %1926 = vmatprep.subr.bf16.mxu0 %v2452_v39 }
 0x477   :  { %1923 = vmatmul.mubr.msk.bf16.vlgmr.msra.gmra.mrb[20].mxu0 %vm269_vm0, %v2082_v8 }
 0x478   :  { %1927 = vmatpush3.bf16.msra.mxu0 %v1164_v59  ;;  %1930 = vmatprep.mubr.msk.bf16.mxu0 %vm2453_vm1, %v2452_v39 }
 0x479   :  { %1928 = vmatprep.subr.bf16.mxu0 %v2452_v39 }
 0x47c   :  { %1929 = vmatpush3.bf16.msra.mxu0 %v1165_v7 }
 0x47d   :  { %1954 = vmatprep.subr.bf16.mxu0 %v2452_v39 }
 0x47f   :  { %1931 = vmatmul.mubr.msk.bf16.vlgmr.msra.gmra.mrb[24].mxu0 %vm269_vm0, %v2083_v9 }
 0x480   :  { %1955 = vmatpush3.bf16.msra.mxu0 %v2084_v10  ;;  %1970 = vmatprep.mubr.msk.bf16.mxu0 %vm2453_vm1, %v2452_v39 }
 0x481   :  { %1956 = vmatprep.subr.bf16.mxu0 %v2452_v39 }
 0x484   :  { %1957 = vmatpush3.bf16.msra.mxu0 %v2085_v5 }
 0x485   :  { %1958 = vmatprep.subr.bf16.mxu0 %v2452_v39 }
 0x488   :  { %1959 = vmatpush3.bf16.msra.mxu0 %v2087_v11 }
 0x489   :  { %1960 = vmatprep.subr.bf16.mxu0 %v2452_v39 }
 0x48c   :  { %1961 = vmatpush3.bf16.msra.mxu0 %v2089_v12 }
 0x48d   :  { %1962 = vmatprep.subr.bf16.mxu0 %v2452_v39 }
 0x490   :  { %1963 = vmatpush3.bf16.msra.mxu0 %v2091_v13 }
 0x491   :  { %1964 = vmatprep.subr.bf16.mxu0 %v2452_v39 }
 0x494   :  { %1965 = vmatpush3.bf16.msra.mxu0 %v2093_v14 }
 0x495   :  { %1966 = vmatprep.subr.bf16.mxu0 %v2452_v39 }
 0x498   :  { %1967 = vmatpush3.bf16.msra.mxu0 %v2095_v15 }
 0x499   :  { %1968 = vmatprep.subr.bf16.mxu0 %v2452_v39 }
 0x49c   :  { %1969 = vmatpush3.bf16.msra.mxu0 %v2097_v17 }
 0x54a   :  { %v1210_v20 = vpop.f32.mrb[20].mxu0 }
 0x54b   :  { %v1924_v21 = vpop.f32.mrb[21].mxu0 }
 0x54c   :  { %v1213_v22 = vpop.f32.mrb[22].mxu0 }
 0x54d   :  { %v1268_v23 = vpack.c.bf16 %v1213_v22, %v1210_v20  ;;  %v1925_v24 = vpop.f32.mrb[23].mxu0 }
 0x54f   :  { %1971 = vmatmul.mubr.bf16.vlgmr.msra.gmra.mrb[28].mxu0 %v1268_v23 }
 0x552   :  { %v1261_v25 = vpop.f32.mrb[24].mxu0 }
 0x553   :  { %v1932_v26 = vpop.f32.mrb[25].mxu0 }
 0x554   :  { %v1264_v27 = vpop.f32.mrb[26].mxu0 }
 0x555   :  { %v1285_v29 = vpack.c.bf16 %v1264_v27, %v1261_v25  ;;  %v1933_v30 = vpop.f32.mrb[27].mxu0 }
 0x557   :  { %1951 = vmatmul.mubr.bf16.vlgmr.msra.gmra.mrb[20].mxu1 %v1285_v29 }
 0x558   :  { %1975 = vmatpush3.bf16.msra.mxu1 %v2100_v28  ;;  %1990 = vmatprep.mubr.msk.bf16.mxu1 %vm2453_vm1, %v2452_v39 }
 0x559   :  { %1976 = vmatprep.subr.bf16.mxu1 %v2452_v39 }
 0x55c   :  { %1977 = vmatpush3.bf16.msra.mxu1 %v2101_v31 }
 0x55d   :  { %1978 = vmatprep.subr.bf16.mxu1 %v2452_v39 }
 0x560   :  { %1979 = vmatpush3.bf16.msra.mxu1 %v2102_v32 }
 0x561   :  { %1980 = vmatprep.subr.bf16.mxu1 %v2452_v39 }
 0x564   :  { %1981 = vmatpush3.bf16.msra.mxu1 %v2103_v33 }
 0x565   :  { %1982 = vmatprep.subr.bf16.mxu1 %v2452_v39 }
 0x568   :  { %1983 = vmatpush3.bf16.msra.mxu1 %v2104_v34 }
 0x569   :  { %1984 = vmatprep.subr.bf16.mxu1 %v2452_v39 }
 0x56c   :  { %1985 = vmatpush3.bf16.msra.mxu1 %v2105_v35 }
 0x56d   :  { %1986 = vmatprep.subr.bf16.mxu1 %v2452_v39 }
 0x570   :  { %1987 = vmatpush3.bf16.msra.mxu1 %v2106_v36 }
 0x571   :  { %1988 = vmatprep.subr.bf16.mxu1 %v2452_v39 }
 0x574   :  { %1989 = vmatpush3.bf16.msra.mxu1 %v2107_v37 }
 0x622   :  { %v1473_v38 = vpop.f32.mrb[28].mxu0 }
 0x623   :  { %v1972_v40 = vpop.f32.mrb[29].mxu0 }
 0x624   :  { %v1476_v41 = vpop.f32.mrb[30].mxu0 }
 0x625   :  { %v1973_v42 = vpop.f32.mrb[31].mxu0 }
 0x62a   :  { %v1384_v43 = vpop.f32.mrb[20].mxu1 }
 0x62b   :  { %v1474_v45 = vadd.f32 %v1473_v38, %v1384_v43  ;;  %v1952_v46 = vpop.f32.mrb[21].mxu1 }
 0x62c   :  { %v1387_v47 = vpop.f32.mrb[22].mxu1 }
 0x62d   :  { %v1487_v48 = vadd.f32 %v1739_v44, %v1474_v45  ;;  %v1477_v49 = vadd.f32 %v1476_v41, %v1387_v47  ;;  %v1953_v50 = vpop.f32.mrb[23].mxu1 }
 0x62f   :  { %v1488_v51 = vadd.f32 %v1739_v44, %v1477_v49  ;;  %v1489_v52 = vmax.f32 %v1487_v48, 0.0 }
 0x631   :  { %v1490_v39 = vmax.f32 %v1488_v51, 0.0 }
 0x633   :  { %v1491_v53 = vpack.c.bf16 %v1490_v39, %v1489_v52 }
 0x635   :  { %1991 = vmatmul.mubr.bf16.vlgmr.msra.gmra.mrb[24].mxu1 %v1491_v53 }
 0x636   :  { %2385 = shalt.err (!%p2382_p2)
}
 0x637   :  { %s2386_s29 = scalar_lea.hbm %s2879_s16, 512 }
 0x638   :  { %p2387_p3 = scmp.ne.s32.totalorder %s2879_s16, %s2386_s29  ;;  %p2390_p4 = scmp.lt.u32.totalorder %s2386_s29, %s2879_s16 }
 0x63a   :  { %p2392_p5 = pnand %p2390_p4, %p2387_p3 }
 0x63c   :  { %2395 = shalt.err (!%p2392_p5)
}
 0x63d   :  { %1629 = dma.vmem_to_hbm [thread:$0]  %s1624_s8, 512, %s2879_s16, [#allocation24], %s2447_s4, %s2447_s4, %s2448_s7  }
 0x63e   :  { %v1740_v54 = vld [vmem:[%s2877_s14] ss:$0 sm:$0xff]  ;;  %s2455_s11 = smov [#allocation22]  }
 0x63f   :  { %s1611_s28 = sshll.u32 %s2455_s11, 4  ;;  %s1612_s28 = int_to_ptr.vmem [resolvable:$true] %s1611_s28 }
 0x640   :  { %s2396_s13 = scalar_lea.vmem %s1612_s28, 256  ;;  %p2401_p7 = scmp.lt.s32.totalorder %s1612_s28, %s1612_s28 }
 0x641   :  { %p2397_p6 = scmp.ne.s32.totalorder %s1612_s28, %s2396_s13  ;;  %p2402_p8 = scmp.lt.s32.totalorder %s2396_s13, %s2396_s13 }
 0x643   :  { %p2403_p9 = por %p2402_p8, %p2401_p7 }
 0x645   :  { %p2404_p10 = pnand %p2403_p9, %p2397_p6 }
 0x708   :  { %v1597_v55 = vpop.f32.mrb[24].mxu1 }
 0x709   :  { %v1598_v56 = vadd.f32 %v1740_v54, %v1597_v55  ;;  %v1992_v57 = vpop.f32.mrb[25].mxu1 }
 0x70a   :  { %v1600_v58 = vpop.f32.mrb[26].mxu1 }
 0x70b   :  { %1604 = vst [vmem:[#allocation22] sm:$0xff] %v1598_v56  ;;  %v1601_v59 = vadd.f32 %v1740_v54, %v1600_v58  ;;  %v1993_v60 = vpop.f32.mrb[27].mxu1 }
 0x70d   :  { %1605 = vst [vmem:[#allocation22 + $0x8] sm:$0xff] %v1601_v59 }
 0x70e   :  { %2407 = shalt.err (!%p2404_p10)
}
 0x70f   :  { %s2408_s18 = scalar_lea.hbm %s2878_s15, 256 }
 0x710   :  { %p2409_p11 = scmp.ne.s32.totalorder %s2878_s15, %s2408_s18  ;;  %p2412_p12 = scmp.lt.u32.totalorder %s2408_s18, %s2878_s15 }
 0x712   :  { %p2414_p13 = pnand %p2412_p12, %p2409_p11 }
 0x714   :  { %2417 = shalt.err (!%p2414_p13)
}
 0x715   :  { %1617 = dma.vmem_to_hbm [thread:$0]  %s1612_s28, 256, %s2878_s15, [#allocation4], %s2447_s4, %s2447_s4, %s2448_s7  }
 0x716   :  { %2432 = dma.done.wait [#allocation4], 256  }
 0x717   :  { %2433 = vsyncadd [#allocation4], 4294967040 }
 0x718   :  { %2434 = dma.done.wait [#allocation24], 512  }
 0x719   :  { %2435 = vsyncadd [#allocation24], 4294966784 }
 0x71a   :  { %1636 = vsyncpa [#allocation3], 1 }
 0x71b   :  { %1637 = vsyncpa [#allocation6], 1 }
 0x71c   :  { %1638 = vsyncpa [#allocation9], 1 }
 0x71d   :  { %1639 = vsyncpa [#allocation12], 1 }
 0x71e   :  { %1640 = vsyncpa [#allocation15], 1 }
 0x71f   :  { %1641 = vsyncpa [#allocation18], 1 }
 0x720   :  { %1642 = vsyncpa [#allocation21], 1 }
 0x721   :  { %1643 = vsyncpa [#allocation4], 1 }
 0x722   :  { %1644 = vsyncpa [#allocation24], 1 }

</bundles_post_ra>
